<compile_context>
chip_gen: v5e
topology: v5e:2x2
jax: 0.10.0
libtpu: 0.0.40
codegen_flags: <defaults>
</compile_context>

<pallas_src>
import functools
import math

import jax
import jax.numpy as jnp
from jax.experimental import pallas as pl
from jax.experimental.pallas import tpu as pltpu


def _round_up(x, m):
    return ((x + m - 1) // m) * m


def _cdiv(a, b):
    return -(-a // b)


# --------------------------------------------------------------------------------------
# Kernel
# --------------------------------------------------------------------------------------
def _wave_block_kernel(x_ref, w_in_ref, b_in_ref, w_fg0_ref, b_fg0_ref, *rest,
                       n_layers, h_lane, gate_dtype):
    """One row-block of packed positions (each row = P positions across 128 lanes).

    x_ref:      (R, P*c_in)              compute dtype
    w_in_ref:   (P*c_in, h_lane)         block-diagonal in_conv weight
    w_fg0_ref:  (h_lane, 2*h_lane)       layer-0 [filter | gate]
    w_sfg_ref:  (n_layers-1, h_lane, 3*h_lane)  [skip_l | filter_{l+1} | gate_{l+1}]
    w_sl_ref:   (h_lane, h_lane)         last layer's skip weight
    out_ref:    (R, h_lane)
    """
    if n_layers > 1:
        w_sfg_ref, b_sfg_ref, w_sl_ref, b_sl_ref, out_ref = rest
    else:
        w_sl_ref, b_sl_ref, out_ref = rest

    x = x_ref[...]
    mm_dtype = x.dtype

    # in_conv: 1x1 conv == per-position channel matmul; f32 accumulation.
    h_f32 = jnp.dot(x, w_in_ref[...], preferred_element_type=jnp.float32) + b_in_ref[...]
    x_skip = h_f32                                   # residual/skip path stays f32
    h = h_f32.astype(mm_dtype)

    # Layer-0 fused filter+gate matmul.
    z = jnp.dot(h, w_fg0_ref[...], preferred_element_type=jnp.float32) + b_fg0_ref[...]

    for layer in range(n_layers):
        filt = z[:, :h_lane].astype(gate_dtype)
        gate = z[:, h_lane:2 * h_lane].astype(gate_dtype)
        # sigmoid(g) == 0.5*tanh(0.5*g) + 0.5 : one EUP op per element (no exp + divide).
        h_g = jnp.tanh(filt) * (jnp.tanh(gate * 0.5) * 0.5 + 0.5)
        h = h_g.astype(mm_dtype)

        if layer < n_layers - 1:
            # Fused [skip_l | filter_{l+1} | gate_{l+1}]: one matmul, shared LHS h_l.
            zz = jnp.dot(h, w_sfg_ref[layer], preferred_element_type=jnp.float32)
            zz = zz + b_sfg_ref[layer]
            s = zz[:, :h_lane]
            z = zz[:, h_lane:]
        else:
            s = jnp.dot(h, w_sl_ref[...], preferred_element_type=jnp.float32) + b_sl_ref[...]

        x_skip = x_skip + s

    out_ref[...] = x_skip.astype(out_ref.dtype)


# --------------------------------------------------------------------------------------
# Parameters (mirrors the PyTorch module's shapes / init)
# --------------------------------------------------------------------------------------
def init_params(key, in_dim, h_dim, n_layers, kernel_size):
    ks = jax.random.split(key, 6)
    relu_gain = math.sqrt(2.0)

    def xavier_uniform(k, shape, fan_in, fan_out, gain):
        bound = gain * math.sqrt(6.0 / (fan_in + fan_out))
        return jax.random.uniform(k, shape, jnp.float32, -bound, bound)

    # in_conv: Conv2d(in_dim, h_dim, (1,1)), xavier_uniform(relu gain), zero bias.
    w_in = xavier_uniform(ks[0], (in_dim, h_dim), in_dim, h_dim, relu_gain)
    b_in = jnp.zeros((1, h_dim), jnp.float32)

    # gated TCN filter/gate convs: Conv2d(h_dim, h_dim, (1, K)), default PyTorch init.
    fan_in = h_dim * kernel_size
    bound = 1.0 / math.sqrt(fan_in)
    w_f = jax.random.uniform(ks[1], (n_layers, kernel_size, h_dim, h_dim),
                             jnp.float32, -bound, bound)
    b_f = jax.random.uniform(ks[2], (n_layers, 1, h_dim), jnp.float32, -bound, bound)
    w_g = jax.random.uniform(ks[3], (n_layers, kernel_size, h_dim, h_dim),
                             jnp.float32, -bound, bound)
    b_g = jax.random.uniform(ks[4], (n_layers, 1, h_dim), jnp.float32, -bound, bound)

    # skip convs: Conv2d(h_dim, h_dim, (1,1)), xavier_uniform(relu gain), zero bias.
    w_s = xavier_uniform(ks[5], (n_layers, h_dim, h_dim), h_dim, h_dim, relu_gain)
    b_s = jnp.zeros((n_layers, 1, h_dim), jnp.float32)

    return dict(w_in=w_in, b_in=b_in, w_f=w_f, b_f=b_f,
                w_g=w_g, b_g=b_g, w_s=w_s, b_s=b_s)


def _block_diag(w, p, in_lane, out_lane):
    """w: (ci, co) -> (in_lane, out_lane) with p diagonal copies (zeros elsewhere)."""
    ci, co = w.shape
    out = jnp.zeros((in_lane, out_lane), jnp.float32)
    for q in range(p):
        out = out.at[q * ci:(q + 1) * ci, q * co:(q + 1) * co].set(w)
    return out


def _tile_bias(b, p, out_lane):
    """b: (co,) -> (1, out_lane) with p copies (zeros elsewhere)."""
    co = b.shape[0]
    out = jnp.zeros((1, out_lane), jnp.float32)
    for q in range(p):
        out = out.at[0, q * co:(q + 1) * co].set(b)
    return out


def _fuse_and_pack_params(params, c_in, h_dim, p, h_lane, n_layers, compute_dtype):
    """Position-packed block-diagonal weights + skip/next-fg fusion."""
    wf = params["w_f"][:, 0]                     # kernel_size == 1
    wg = params["w_g"][:, 0]
    bf = params["b_f"].reshape(n_layers, h_dim)
    bg = params["b_g"].reshape(n_layers, h_dim)
    ws = params["w_s"]
    bs = params["b_s"].reshape(n_layers, h_dim)

    w_in = _block_diag(params["w_in"], p, p * c_in, h_lane)
    b_in = _tile_bias(params["b_in"].reshape(h_dim), p, h_lane)

    w_fg0 = jnp.concatenate([_block_diag(wf[0], p, h_lane, h_lane),
                             _block_diag(wg[0], p, h_lane, h_lane)], axis=1)
    b_fg0 = jnp.concatenate([_tile_bias(bf[0], p, h_lane),
                             _tile_bias(bg[0], p, h_lane)], axis=1)

    w_sl = _block_diag(ws[n_layers - 1], p, h_lane, h_lane)
    b_sl = _tile_bias(bs[n_layers - 1], p, h_lane)

    cast = lambda a: a.astype(compute_dtype)

    if n_layers > 1:
        w_sfg = jnp.stack([
            jnp.concatenate([_block_diag(ws[l], p, h_lane, h_lane),
                             _block_diag(wf[l + 1], p, h_lane, h_lane),
                             _block_diag(wg[l + 1], p, h_lane, h_lane)], axis=1)
            for l in range(n_layers - 1)])
        b_sfg = jnp.stack([
            jnp.concatenate([_tile_bias(bs[l], p, h_lane),
                             _tile_bias(bf[l + 1], p, h_lane),
                             _tile_bias(bg[l + 1], p, h_lane)], axis=1)
            for l in range(n_layers - 1)])
        return (cast(w_in), b_in, cast(w_fg0), b_fg0,
                cast(w_sfg), b_sfg, cast(w_sl), b_sl)

    return (cast(w_in), b_in, cast(w_fg0), b_fg0, cast(w_sl), b_sl)


def _default_gate_dtype(compute_dtype):
    """bf16 gating on v6e/v7x (bf16 EUP); f32 on v5e and older (no bf16 VPU/EUP)."""
    try:
        kind = jax.devices()[0].device_kind.lower()
    except Exception:
        kind = ""
    if any(tag in kind for tag in ("v2", "v3", "v4", "v5")):
        return jnp.float32
    return compute_dtype


# --------------------------------------------------------------------------------------
# Wrappers
# --------------------------------------------------------------------------------------
def wave_block_forward_flat(x_flat, params, *, n_layers, kernel_size,
                            block_rows=2048, compute_dtype=jnp.bfloat16,
                            gate_dtype=None, out_dtype=jnp.float32):
    """x_flat: (M, c_in) channels-last positions.  Returns (M, h_dim) in out_dtype."""
    if kernel_size != 1:
        # Matches the PyTorch module: with conv_module=None and K>1 the residual add is
        # shape-invalid (a valid dilated conv shrinks L).
        raise NotImplementedError("kernel_size > 1 requires a padding conv_module")

    m, c_in = x_flat.shape
    h_dim = params["w_in"].shape[1]
    gate_dtype = _default_gate_dtype(compute_dtype) if gate_dtype is None else gate_dtype

    # Position packing: P positions per 128-lane row when possible, else channel pad.
    if h_dim <= 128 and 128 % h_dim == 0:
        p, h_lane = 128 // h_dim, 128
    else:
        p, h_lane = 1, _round_up(h_dim, 128)

    weights = _fuse_and_pack_params(params, c_in, h_dim, p, h_lane, n_layers,
                                    compute_dtype)

    # Row-block sizing (rows are packed rows of P positions each).
    row_align = 32                                   # sublane pack for f32 / bf16 / int8
    total_rows = _round_up(_cdiv(m, p), row_align)
    rows = min(_round_up(max(block_rows // p, 1), row_align), total_rows)
    n_blocks = _cdiv(total_rows, rows)
    if n_blocks < 2 and total_rows >= 2 * row_align:
        rows = _round_up(_cdiv(total_rows, 2), row_align)   # keep grid >= 2 (v7x: 2 TCs)
        n_blocks = _cdiv(total_rows, rows)
    m_rows = n_blocks * rows
    m_pos = m_rows * p

    x2 = x_flat
    if m_pos != m:
        x2 = jnp.pad(x2, ((0, m_pos - m), (0, 0)))
    x2 = x2.reshape(m_rows, p * c_in).astype(compute_dtype)

    kernel = functools.partial(_wave_block_kernel, n_layers=n_layers,
                               h_lane=h_lane, gate_dtype=gate_dtype)

    def const_spec(a):        # whole-array, constant block index -> fetched once
        nd = a.ndim
        return pl.BlockSpec(a.shape, lambda i, _nd=nd: (0,) * _nd)

    # Cost estimate on the real (unpadded) work; 2 tanh per element per layer.
    flops = 2 * m * (c_in * h_dim + n_layers * (h_dim * 2 * h_dim + h_dim * h_dim))
    transcendentals = 2 * m * h_dim * n_layers
    bytes_accessed = int(x2.size) * x2.dtype.itemsize \
        + sum(int(a.size) * a.dtype.itemsize for a in weights) \
        + m_rows * h_lane * jnp.dtype(out_dtype).itemsize
    cost = pl.CostEstimate(flops=int(flops), transcendentals=int(transcendentals),
                           bytes_accessed=int(bytes_accessed))

    out = pl.pallas_call(
        kernel,
        out_shape=jax.ShapeDtypeStruct((m_rows, h_lane), out_dtype),
        grid=(n_blocks,),
        in_specs=[pl.BlockSpec((rows, p * c_in), lambda i: (i, 0))]
                 + [const_spec(a) for a in weights],
        out_specs=pl.BlockSpec((rows, h_lane), lambda i: (i, 0)),
        compiler_params=pltpu.CompilerParams(
            dimension_semantics=("parallel",),       # feeds both v7x TensorCores
            vmem_limit_bytes=32 * 1024 * 1024),
        cost_estimate=cost,
    )(x2, *weights)

    if p > 1:
        out = out.reshape(m_pos, h_dim)[:m]          # unpack positions
    else:
        out = out[:m, :h_dim]                        # drop channel padding
    return out


def wave_block_forward(x, params, *, n_layers, kernel_size, **kw):
    """x: (B, C_in, N, L) NCHW (PyTorch layout).  Returns (B, h_dim, N, L) float32.

    The NCHW<->channels-last transposes here are test scaffolding; a real model should
    keep the channels-last layout end-to-end and call wave_block_forward_flat directly.
    """
    b, c_in, n, l = x.shape
    h_dim = params["w_in"].shape[1]
    x_flat = jnp.transpose(x, (0, 2, 3, 1)).reshape(b * n * l, c_in)
    out = wave_block_forward_flat(x_flat, params, n_layers=n_layers,
                                  kernel_size=kernel_size, **kw)
    out = out.reshape(b, n, l, h_dim).astype(jnp.float32)
    return jnp.transpose(out, (0, 3, 1, 2))


def wave_block_reference(x, params, *, n_layers, kernel_size):
    """Pure-JAX f32 reference of the PyTorch forward (for verification)."""
    xt = jnp.transpose(x, (0, 2, 3, 1))              # (B, N, L, C_in)
    h = xt @ params["w_in"] + params["b_in"][0]
    x_skip = h
    for layer in range(n_layers):
        dil = 2 ** layer
        out_len = h.shape[2] - dil * (kernel_size - 1)
        acc_f = params["b_f"][layer, 0]
        acc_g = params["b_g"][layer, 0]
        for k in range(kernel_size):
            tap = h[:, :, k * dil:k * dil + out_len, :]
            acc_f = acc_f + tap @ params["w_f"][layer, k]
            acc_g = acc_g + tap @ params["w_g"][layer, k]
        h = jnp.tanh(acc_f) * jax.nn.sigmoid(acc_g)
        s = h @ params["w_s"][layer] + params["b_s"][layer, 0]
        x_skip = x_skip + s
    return jnp.transpose(x_skip, (0, 3, 1, 2))       # (B, h_dim, N, L)


if __name__ == "__main__":
    B, c_in, N, L = 2, 4, 8, 32          # B*N*L = 512 positions -> 128 packed rows
    h_dim = 32
    n_layers = 3
    kernel_size = 1                       # only valid config with conv_module=None

    key = jax.random.PRNGKey(0)
    kx, kp = jax.random.split(key)
    x = jax.random.normal(kx, (B, c_in, N, L), jnp.float32)
    params = init_params(kp, c_in, h_dim, n_layers, kernel_size)

    ref = wave_block_reference(x, params, n_layers=n_layers, kernel_size=kernel_size)

    # float32 operand path: tight check against the reference.
    out_f32 = wave_block_forward(x, params, n_layers=n_layers, kernel_size=kernel_size,
                                 compute_dtype=jnp.float32)
    out_f32 = jax.block_until_ready(out_f32)
    assert out_f32.shape == (B, h_dim, N, L), out_f32.shape
    err32 = float(jnp.max(jnp.abs(out_f32 - ref)))
    assert err32 < 2e-2, f"f32 max abs err = {err32}"

    # bfloat16 operand path (default; bf16 gating on v6e/v7x, f32 gating on v5e).
    out_bf16 = wave_block_forward(x, params, n_layers=n_layers, kernel_size=kernel_size,
                                  compute_dtype=jnp.bfloat16)
    out_bf16 = jax.block_until_ready(out_bf16)
    assert out_bf16.shape == (B, h_dim, N, L), out_bf16.shape
    err16 = float(jnp.max(jnp.abs(out_bf16 - ref)))
    assert err16 < 1e-1, f"bf16 max abs err = {err16}"

    print("KERNEL_OK")
</pallas_src>

<mosaic_0001>
module attributes {stable_mosaic.version = 11 : i64} {
  func.func @_wave_block_kernel(%arg0: i32, %arg1: memref<64x16xf32, #tpu.memory_space<vmem>>, %arg2: memref<16x128xf32, #tpu.memory_space<vmem>>, %arg3: memref<1x128xf32, #tpu.memory_space<vmem>>, %arg4: memref<128x256xf32, #tpu.memory_space<vmem>>, %arg5: memref<1x256xf32, #tpu.memory_space<vmem>>, %arg6: memref<2x128x384xf32, #tpu.memory_space<vmem>>, %arg7: memref<2x1x384xf32, #tpu.memory_space<vmem>>, %arg8: memref<128x128xf32, #tpu.memory_space<vmem>>, %arg9: memref<1x128xf32, #tpu.memory_space<vmem>>, %arg10: memref<64x128xf32, #tpu.memory_space<vmem>>) attributes {dimension_semantics = [#tpu.dimension_semantics<parallel>], iteration_bounds = array<i64: 2>, scalar_prefetch = 0 : i64, scratch_operands = 0 : i64, tpu.core_type = #tpu.core_type<tc>, window_params = [{transform_indices = @transform_0, window_bounds = array<i64: 64, 16>}, {pipeline_mode = #tpu.pipeline_mode<synchronous>, transform_indices = @transform_1, window_bounds = array<i64: 16, 128>}, {pipeline_mode = #tpu.pipeline_mode<synchronous>, transform_indices = @transform_2, window_bounds = array<i64: 1, 128>}, {pipeline_mode = #tpu.pipeline_mode<synchronous>, transform_indices = @transform_3, window_bounds = array<i64: 128, 256>}, {pipeline_mode = #tpu.pipeline_mode<synchronous>, transform_indices = @transform_4, window_bounds = array<i64: 1, 256>}, {pipeline_mode = #tpu.pipeline_mode<synchronous>, transform_indices = @transform_5, window_bounds = array<i64: 2, 128, 384>}, {pipeline_mode = #tpu.pipeline_mode<synchronous>, transform_indices = @transform_6, window_bounds = array<i64: 2, 1, 384>}, {pipeline_mode = #tpu.pipeline_mode<synchronous>, transform_indices = @transform_7, window_bounds = array<i64: 128, 128>}, {pipeline_mode = #tpu.pipeline_mode<synchronous>, transform_indices = @transform_8, window_bounds = array<i64: 1, 128>}, {transform_indices = @transform_9, window_bounds = array<i64: 64, 128>}]} {
    %c0 = arith.constant 0 : index
    %c0_0 = arith.constant 0 : index
    %0 = vector.load %arg1[%c0, %c0_0] : memref<64x16xf32, #tpu.memory_space<vmem>>, vector<64x16xf32>
    %c0_1 = arith.constant 0 : index
    %c0_2 = arith.constant 0 : index
    %1 = vector.load %arg2[%c0_1, %c0_2] : memref<16x128xf32, #tpu.memory_space<vmem>>, vector<16x128xf32>
    %cst = arith.constant dense<0.000000e+00> : vector<64x128xf32>
    %2 = tpu.matmul %0, %1, %cst {dimension_numbers = #tpu.dot_dimension_numbers<[1], [0], [0], [1], [0, 0, 1, 1], [], []>} : vector<64x16xf32>, vector<16x128xf32>, vector<64x128xf32> -> vector<64x128xf32>
    %c0_3 = arith.constant 0 : index
    %c0_4 = arith.constant 0 : index
    %3 = vector.load %arg3[%c0_3, %c0_4] : memref<1x128xf32, #tpu.memory_space<vmem>>, vector<1x128xf32>
    %4 = vector.broadcast %3 : vector<1x128xf32> to vector<64x128xf32>
    %5 = arith.addf %2, %4 : vector<64x128xf32>
    %c0_5 = arith.constant 0 : index
    %c0_6 = arith.constant 0 : index
    %6 = vector.load %arg4[%c0_5, %c0_6] : memref<128x256xf32, #tpu.memory_space<vmem>>, vector<128x256xf32>
    %cst_7 = arith.constant dense<0.000000e+00> : vector<64x256xf32>
    %7 = tpu.matmul %5, %6, %cst_7 {dimension_numbers = #tpu.dot_dimension_numbers<[1], [0], [0], [1], [0, 0, 1, 1], [], []>} : vector<64x128xf32>, vector<128x256xf32>, vector<64x256xf32> -> vector<64x256xf32>
    %c0_8 = arith.constant 0 : index
    %c0_9 = arith.constant 0 : index
    %8 = vector.load %arg5[%c0_8, %c0_9] : memref<1x256xf32, #tpu.memory_space<vmem>>, vector<1x256xf32>
    %9 = vector.broadcast %8 : vector<1x256xf32> to vector<64x256xf32>
    %10 = arith.addf %7, %9 : vector<64x256xf32>
    %11 = vector.extract_strided_slice %10 {offsets = [0, 0], sizes = [64, 128], strides = [1, 1]} : vector<64x256xf32> to vector<64x128xf32>
    %12 = vector.extract_strided_slice %10 {offsets = [0, 128], sizes = [64, 128], strides = [1, 1]} : vector<64x256xf32> to vector<64x128xf32>
    %13 = math.tanh %11 : vector<64x128xf32>
    %cst_10 = arith.constant 5.000000e-01 : f32
    %14 = vector.broadcast %cst_10 : f32 to vector<64x128xf32>
    %15 = arith.mulf %12, %14 : vector<64x128xf32>
    %16 = math.tanh %15 : vector<64x128xf32>
    %cst_11 = arith.constant 5.000000e-01 : f32
    %17 = vector.broadcast %cst_11 : f32 to vector<64x128xf32>
    %18 = arith.mulf %16, %17 : vector<64x128xf32>
    %cst_12 = arith.constant 5.000000e-01 : f32
    %19 = vector.broadcast %cst_12 : f32 to vector<64x128xf32>
    %20 = arith.addf %18, %19 : vector<64x128xf32>
    %21 = arith.mulf %13, %20 : vector<64x128xf32>
    %c0_13 = arith.constant 0 : index
    %c0_14 = arith.constant 0 : index
    %c0_15 = arith.constant 0 : index
    %22 = vector.load %arg6[%c0_13, %c0_14, %c0_15] : memref<2x128x384xf32, #tpu.memory_space<vmem>>, vector<1x128x384xf32>
    %23 = vector.shape_cast %22 : vector<1x128x384xf32> to vector<128x384xf32>
    %cst_16 = arith.constant dense<0.000000e+00> : vector<64x384xf32>
    %24 = tpu.matmul %21, %23, %cst_16 {dimension_numbers = #tpu.dot_dimension_numbers<[1], [0], [0], [1], [0, 0, 1, 1], [], []>} : vector<64x128xf32>, vector<128x384xf32>, vector<64x384xf32> -> vector<64x384xf32>
    %c0_17 = arith.constant 0 : index
    %c0_18 = arith.constant 0 : index
    %c0_19 = arith.constant 0 : index
    %25 = vector.load %arg7[%c0_17, %c0_18, %c0_19] : memref<2x1x384xf32, #tpu.memory_space<vmem>>, vector<1x1x384xf32>
    %26 = vector.shape_cast %25 : vector<1x1x384xf32> to vector<1x384xf32>
    %27 = vector.broadcast %26 : vector<1x384xf32> to vector<64x384xf32>
    %28 = arith.addf %24, %27 : vector<64x384xf32>
    %29 = vector.extract_strided_slice %28 {offsets = [0, 0], sizes = [64, 128], strides = [1, 1]} : vector<64x384xf32> to vector<64x128xf32>
    %30 = vector.extract_strided_slice %28 {offsets = [0, 128], sizes = [64, 256], strides = [1, 1]} : vector<64x384xf32> to vector<64x256xf32>
    %31 = arith.addf %5, %29 : vector<64x128xf32>
    %32 = vector.extract_strided_slice %30 {offsets = [0, 0], sizes = [64, 128], strides = [1, 1]} : vector<64x256xf32> to vector<64x128xf32>
    %33 = vector.extract_strided_slice %30 {offsets = [0, 128], sizes = [64, 128], strides = [1, 1]} : vector<64x256xf32> to vector<64x128xf32>
    %34 = math.tanh %32 : vector<64x128xf32>
    %cst_20 = arith.constant 5.000000e-01 : f32
    %35 = vector.broadcast %cst_20 : f32 to vector<64x128xf32>
    %36 = arith.mulf %33, %35 : vector<64x128xf32>
    %37 = math.tanh %36 : vector<64x128xf32>
    %cst_21 = arith.constant 5.000000e-01 : f32
    %38 = vector.broadcast %cst_21 : f32 to vector<64x128xf32>
    %39 = arith.mulf %37, %38 : vector<64x128xf32>
    %cst_22 = arith.constant 5.000000e-01 : f32
    %40 = vector.broadcast %cst_22 : f32 to vector<64x128xf32>
    %41 = arith.addf %39, %40 : vector<64x128xf32>
    %42 = arith.mulf %34, %41 : vector<64x128xf32>
    %c1 = arith.constant 1 : index
    %c0_23 = arith.constant 0 : index
    %c0_24 = arith.constant 0 : index
    %43 = vector.load %arg6[%c1, %c0_23, %c0_24] : memref<2x128x384xf32, #tpu.memory_space<vmem>>, vector<1x128x384xf32>
    %44 = vector.shape_cast %43 : vector<1x128x384xf32> to vector<128x384xf32>
    %cst_25 = arith.constant dense<0.000000e+00> : vector<64x384xf32>
    %45 = tpu.matmul %42, %44, %cst_25 {dimension_numbers = #tpu.dot_dimension_numbers<[1], [0], [0], [1], [0, 0, 1, 1], [], []>} : vector<64x128xf32>, vector<128x384xf32>, vector<64x384xf32> -> vector<64x384xf32>
    %c1_26 = arith.constant 1 : index
    %c0_27 = arith.constant 0 : index
    %c0_28 = arith.constant 0 : index
    %46 = vector.load %arg7[%c1_26, %c0_27, %c0_28] : memref<2x1x384xf32, #tpu.memory_space<vmem>>, vector<1x1x384xf32>
    %47 = vector.shape_cast %46 : vector<1x1x384xf32> to vector<1x384xf32>
    %48 = vector.broadcast %47 : vector<1x384xf32> to vector<64x384xf32>
    %49 = arith.addf %45, %48 : vector<64x384xf32>
    %50 = vector.extract_strided_slice %49 {offsets = [0, 0], sizes = [64, 128], strides = [1, 1]} : vector<64x384xf32> to vector<64x128xf32>
    %51 = vector.extract_strided_slice %49 {offsets = [0, 128], sizes = [64, 256], strides = [1, 1]} : vector<64x384xf32> to vector<64x256xf32>
    %52 = arith.addf %31, %50 : vector<64x128xf32>
    %53 = vector.extract_strided_slice %51 {offsets = [0, 0], sizes = [64, 128], strides = [1, 1]} : vector<64x256xf32> to vector<64x128xf32>
    %54 = vector.extract_strided_slice %51 {offsets = [0, 128], sizes = [64, 128], strides = [1, 1]} : vector<64x256xf32> to vector<64x128xf32>
    %55 = math.tanh %53 : vector<64x128xf32>
    %cst_29 = arith.constant 5.000000e-01 : f32
    %56 = vector.broadcast %cst_29 : f32 to vector<64x128xf32>
    %57 = arith.mulf %54, %56 : vector<64x128xf32>
    %58 = math.tanh %57 : vector<64x128xf32>
    %cst_30 = arith.constant 5.000000e-01 : f32
    %59 = vector.broadcast %cst_30 : f32 to vector<64x128xf32>
    %60 = arith.mulf %58, %59 : vector<64x128xf32>
    %cst_31 = arith.constant 5.000000e-01 : f32
    %61 = vector.broadcast %cst_31 : f32 to vector<64x128xf32>
    %62 = arith.addf %60, %61 : vector<64x128xf32>
    %63 = arith.mulf %55, %62 : vector<64x128xf32>
    %c0_32 = arith.constant 0 : index
    %c0_33 = arith.constant 0 : index
    %64 = vector.load %arg8[%c0_32, %c0_33] : memref<128x128xf32, #tpu.memory_space<vmem>>, vector<128x128xf32>
    %cst_34 = arith.constant dense<0.000000e+00> : vector<64x128xf32>
    %65 = tpu.matmul %63, %64, %cst_34 {dimension_numbers = #tpu.dot_dimension_numbers<[1], [0], [0], [1], [0, 0, 1, 1], [], []>} : vector<64x128xf32>, vector<128x128xf32>, vector<64x128xf32> -> vector<64x128xf32>
    %c0_35 = arith.constant 0 : index
    %c0_36 = arith.constant 0 : index
    %66 = vector.load %arg9[%c0_35, %c0_36] : memref<1x128xf32, #tpu.memory_space<vmem>>, vector<1x128xf32>
    %67 = vector.broadcast %66 : vector<1x128xf32> to vector<64x128xf32>
    %68 = arith.addf %65, %67 : vector<64x128xf32>
    %69 = arith.addf %52, %68 : vector<64x128xf32>
    %c0_37 = arith.constant 0 : index
    %c0_38 = arith.constant 0 : index
    %70 = vector.load %arg10[%c0_37, %c0_38] : memref<64x128xf32, #tpu.memory_space<vmem>>, vector<64x128xf32>
    tpu.vector_store %arg10[%c0_37, %c0_38], %69 {strides = array<i32>} : memref<64x128xf32, #tpu.memory_space<vmem>>, vector<64x128xf32>,
    return
  }
  func.func @transform_0(%arg0: i32) -> (i32, i32) {
    %c0_i32 = arith.constant 0 : i32
    %c0_i32_0 = arith.constant 0 : i32
    return %arg0, %c0_i32 : i32, i32
  }
  func.func @transform_1(%arg0: i32) -> (i32, i32) {
    %c0_i32 = arith.constant 0 : i32
    %c0_i32_0 = arith.constant 0 : i32
    %c0_i32_1 = arith.constant 0 : i32
    return %c0_i32, %c0_i32_0 : i32, i32
  }
  func.func @transform_2(%arg0: i32) -> (i32, i32) {
    %c0_i32 = arith.constant 0 : i32
    %c0_i32_0 = arith.constant 0 : i32
    %c0_i32_1 = arith.constant 0 : i32
    return %c0_i32, %c0_i32_0 : i32, i32
  }
  func.func @transform_3(%arg0: i32) -> (i32, i32) {
    %c0_i32 = arith.constant 0 : i32
    %c0_i32_0 = arith.constant 0 : i32
    %c0_i32_1 = arith.constant 0 : i32
    return %c0_i32, %c0_i32_0 : i32, i32
  }
  func.func @transform_4(%arg0: i32) -> (i32, i32) {
    %c0_i32 = arith.constant 0 : i32
    %c0_i32_0 = arith.constant 0 : i32
    %c0_i32_1 = arith.constant 0 : i32
    return %c0_i32, %c0_i32_0 : i32, i32
  }
  func.func @transform_5(%arg0: i32) -> (i32, i32, i32) {
    %c0_i32 = arith.constant 0 : i32
    %c0_i32_0 = arith.constant 0 : i32
    %c0_i32_1 = arith.constant 0 : i32
    %c0_i32_2 = arith.constant 0 : i32
    return %c0_i32, %c0_i32_0, %c0_i32_1 : i32, i32, i32
  }
  func.func @transform_6(%arg0: i32) -> (i32, i32, i32) {
    %c0_i32 = arith.constant 0 : i32
    %c0_i32_0 = arith.constant 0 : i32
    %c0_i32_1 = arith.constant 0 : i32
    %c0_i32_2 = arith.constant 0 : i32
    return %c0_i32, %c0_i32_0, %c0_i32_1 : i32, i32, i32
  }
  func.func @transform_7(%arg0: i32) -> (i32, i32) {
    %c0_i32 = arith.constant 0 : i32
    %c0_i32_0 = arith.constant 0 : i32
    %c0_i32_1 = arith.constant 0 : i32
    return %c0_i32, %c0_i32_0 : i32, i32
  }
  func.func @transform_8(%arg0: i32) -> (i32, i32) {
    %c0_i32 = arith.constant 0 : i32
    %c0_i32_0 = arith.constant 0 : i32
    %c0_i32_1 = arith.constant 0 : i32
    return %c0_i32, %c0_i32_0 : i32, i32
  }
  func.func @transform_9(%arg0: i32) -> (i32, i32) {
    %c0_i32 = arith.constant 0 : i32
    %c0_i32_0 = arith.constant 0 : i32
    return %arg0, %c0_i32 : i32, i32
  }
}

</mosaic_0001>

<bundles_post_ra>
// kernel: tpu_custom_call.1
= control target key start
LH: loop header
LB: loop body
LE: loop exit
PB: predicated region body
PF: predicated region fallthrough
CT: control target
= control target key end

     0   :  { %s2205_s0 = inlined_call_operand.vmem [shape: f32[128,16], index: 0, kind: input, shape index: {}]   ;;  %s2206_s1 = inlined_call_operand.vmem [shape: f32[16,128], index: 1, kind: input, shape index: {}]   ;;  %s2207_s2 = inlined_call_operand.hbm [shape: f32[1,128], index: 2, kind: input, shape index: {}]   ;;  %s2208_s3 = inlined_call_operand.hbm [shape: f32[128,256], index: 3, kind: input, shape index: {}]   ;;  %s2209_s4 = inlined_call_operand.hbm [shape: f32[1,256], index: 4, kind: input, shape index: {}]   ;;  %s2210_s5 = inlined_call_operand.hbm [shape: f32[2,128,384], index: 5, kind: input, shape index: {}]   ;;  %s2211_s6 = inlined_call_operand.vmem [shape: f32[2,1,384], index: 6, kind: input, shape index: {}]   ;;  %s2212_s7 = inlined_call_operand.vmem [shape: f32[128,128], index: 7, kind: input, shape index: {}]   ;;  %s2213_s8 = inlined_call_operand.vmem [shape: f32[1,128], index: 8, kind: input, shape index: {}]   ;;  %s2214_s9 = inlined_call_operand.hbm [shape: f32[128,128], index: 9, kind: output, shape index: {}]  }
   0x1   :  { %2218 = sst [smem:[#allocation18_spill]] %s2207_s2 }
   0x2   :  { %2219 = sst [smem:[#allocation19_spill]] %s2208_s3 }
   0x3   :  { %14 = vsyncpa [#allocation3], 0 }
   0x4   :  { %15 = vsyncpa [#allocation6], 0 }
   0x5   :  { %16 = vsyncpa [#allocation9], 0 }
   0x6   :  { %17 = vsyncpa [#allocation4], 0 }
   0x7   :  { %19 = vsyncpa [#allocation4 + $0x1], 0  ;;  %s1817_s30 = smov 0   ;;  %s1819_s10 = smov 0  }
   0x8   :  { %s1821_s11 = smov 0   ;;  %s1823_s12 = smov 0  }
   0x9 LB: > { %2220 = sst [smem:[#allocation15_spill]] %s1751_s11  ;;  %s1838_s13 = sadd.s32 4294967295, %s1755_s12   ;;  %s1755_s12 = sphi %s1823_s12, %s2229_s12   ;;  %s1751_s11 = sphi %s1821_s11, %s2231_s11   ;;  %s1747_s10 = sphi %s1819_s10, %s2233_s10   ;;  %s1743_s30 = sphi %s1817_s30, %s2232_s30  }
   0xa   : > { %s1313_s14 = sadd.s32 4294967294, %s1755_s12   ;;  %s1842_s15 = sadd.s32 1, %s1755_s12  }
   0xb   : > { %2221 = sst [smem:[#allocation16_spill]] %s1842_s15  ;;  %s226_s16 = sadd.s32 1, %s1751_s11 }
   0xc   : > { %s223_s17 = ssub.s32 %s1755_s12, %s1842_s15  ;;  %p236_p0 = scmp.ne.s32.totalorder %s1751_s11, %s1747_s10 }
   0xd   : > { %p224_p1 = scmp.eq.s32.totalorder %s223_s17, 0  ;;  %p237_p2 = scmp.eq.s32.totalorder %s1838_s13, 1 }
   0xe   : > { %p242_p3 = scmp.ne.s32.totalorder %s1747_s10, %s1743_s30  ;;  %p243_p4 = scmp.eq.s32.totalorder %s1313_s14, 1 }
   0xf   : > { %s1853_s18 = scalar_select %p224_p1, %s1751_s11, %s226_s16  }
  0x10   : > { %p1855_p5 = por %p237_p2, %p236_p0  ;;  %p1859_p6 = por %p243_p4, %p242_p3 }
  0x11   : > { %2222 = sst [smem:[#allocation17_spill]] %s1853_s18  ;;  %p1314_p7 = scmp.ge.s32.totalorder %s1755_s12, 1 }
  0x12   : > { %p250_p8 = scmp.lt.s32.totalorder %s1755_s12, 3  ;;  %p1412_p9 = scmp.eq.s32.totalorder %s1838_s13, 0 }
  0x13   : > { %s2226_s3 = sld [smem:[#allocation19_spill]]  ;;  %s1757_s25 = smov [#allocation5]  }
  0x14   : > { %p1866_p10 = pnand %p1314_p7, %p250_p8  ;;  %s278_s26 = sshll.u32 %s1757_s25, 4  ;;  %s279_s26 = int_to_ptr.vmem [resolvable:$true] %s278_s26 }
  0x15   : > { %s2228_s2 = sld [smem:[#allocation18_spill]]  ;;  %s1758_s16 = smov 256  }
  0x16   : > { %p1395_p11 = pneg %p1866_p10  ;;  %s1759_s17 = smov 16  }
  0x17   : > { %s1760_s22 = smov [#allocation2]   ;;  %s291_s18 = sshll.u32 %s2209_s4, 4  ;;  %s292_s18 = int_to_ptr.hbm [resolvable:$true] %s291_s18 }
  0x18   : > { %p1877_p12 = pnand %p1412_p9, %p1395_p11  ;;  %s267_s23 = sshll.u32 %s1760_s22, 4  ;;  %s268_s23 = int_to_ptr.vmem [resolvable:$true] %s267_s23 }
  0x19   : > { %s276_s24 = sshll.u32 %s2226_s3, 4  ;;  %s1761_s11 = smov [#allocation7]   ;;  %s277_s24 = int_to_ptr.hbm [resolvable:$true] %s276_s24 }
  0x1a   : > { %1401 = dma.hbm_to_vmem [thread:$0]  (!%p1877_p12), %s277_s24, 4096, %s279_s26, [#allocation6], %s1758_s16, %s1758_s16, %s1759_s17  }
  0x1b   : > { %s265_s14 = sshll.u32 %s2228_s2, 4  ;;  %s302_s2 = sshll.u32 %s2210_s5, 4  ;;  %s266_s14 = int_to_ptr.hbm [resolvable:$true] %s265_s14  ;;  %s303_s2 = int_to_ptr.hbm [resolvable:$true] %s302_s2 }
  0x1c   : > { %1398 = dma.hbm_to_vmem [thread:$0]  (!%p1877_p12), %s266_s14, 16, %s268_s23, [#allocation3]  }
  0x1d   : > { %s293_s15 = sshll.u32 %s1761_s11, 4  ;;  %s1762_s24 = smov [#allocation8]   ;;  %s294_s15 = int_to_ptr.vmem [resolvable:$true] %s293_s15 }
  0x1e   : > { %1404 = dma.hbm_to_vmem [thread:$0]  (!%p1877_p12), %s292_s18, 32, %s294_s15, [#allocation6]  }
  0x1f   : > { %s304_s26 = sshll.u32 %s1762_s24, 4  ;;  %s1763_s3 = smov 384   ;;  %s305_s26 = int_to_ptr.vmem [resolvable:$true] %s304_s26 }
  0x20   : > { %s1764_s16 = smov 24   ;;  %338 = sbr.rel (%p1866_p10) target bundleno = 842 (0x34a), region = 56 }
  0x21   : > { %1407 = dma.hbm_to_vmem [thread:$0]  (!%p1877_p12), %s303_s2, 12288, %s305_s26, [#allocation9], %s1763_s3, %s1763_s3, %s1764_s16  }
  0x25   : > { %1726 = dma.done.wait (%p1412_p9), [#allocation3], 16  }
  0x26   : > { %1728 = vsyncadd (%p1412_p9), [#allocation3], 4294967280 }
  0x27   : > { %1730 = dma.done.wait (%p1412_p9), [#allocation6], 4128  }
  0x28   : > { %1732 = vsyncadd (%p1412_p9), [#allocation6], 4294963168 }
  0x29   : > { %1734 = dma.done.wait (%p1412_p9), [#allocation9], 12288  }
  0x2a   : > { %1736 = vsyncadd (%p1412_p9), [#allocation9], 4294955008  ;;  %s1326_s2 = sshll.u32 %s1838_s13, 3  ;;  %v406_v0 = vld [vmem:[%s2206_s1 + $0x8] sm:$0xff]  ;;  %v405_v1 = vld [vmem:[%s2206_s1] sm:$0xff]  ;;  %vm411_vm0 = vcmask 130048  }
  0x2b   : > { %p391_p13 = scmp.lt.s32.totalorder %s1326_s2, 15  ;;  %1343 = vmatpush.msra.mxu3 %v406_v0  ;;  %450 = vmatpush.msra.mxu0 %v406_v0  ;;  %v507_v4 = vld [vmem:[#allocation5 + $0xf0] sm:$0xff]  ;;  %v505_v5 = vld [vmem:[#allocation5 + $0xe0] sm:$0xff]  ;;  %v508_v26 = vld [vmem:[#allocation5 + $0xf8] sm:$0xff]  ;;  %s387_s28 = sand.u32 1, %s1747_s10  }
  0x2c   : > { %1345 = vmatpush.msra.mxu2 %v507_v4  ;;  %515 = vmatpush.msra.mxu1 %v507_v4  ;;  %v503_v6 = vld [vmem:[#allocation5 + $0xd0] sm:$0xff]  ;;  %v501_v7 = vld [vmem:[#allocation5 + $0xc0] sm:$0xff]  ;;  %v506_v27 = vld [vmem:[#allocation5 + $0xe8] sm:$0xff]  ;;  %s1325_s26 = sshll.u32 %s387_s28, 6  ;;  %s1342_s16 = sshll.u32 %s1838_s13, 6 }
  0x2d   : > { %s2235_s2 = smov (!%p391_p13, %s1326_s2), 15  ;;  %1344 = vmatpush.msra.mxu3 %v405_v1  ;;  %451 = vmatpush.msra.mxu0 %v405_v1  ;;  %v499_v10 = vld [vmem:[#allocation5 + $0xb0] sm:$0xff]  ;;  %v497_v11 = vld [vmem:[#allocation5 + $0xa0] sm:$0xff]  ;;  %v504_v28 = vld [vmem:[#allocation5 + $0xd8] sm:$0xff]  ;;  %s2139_s3 = scalar_lea.vmem [#allocation10], %s1325_s26 }
  0x2e   : > { %s1327_s11 = sshll.u32 %s2235_s2, 3  ;;  %1346 = vmatpush.msra.mxu2 %v505_v5  ;;  %516 = vmatpush.msra.mxu1 %v505_v5  ;;  %v495_v12 = vld [vmem:[#allocation5 + $0x90] sm:$0xff]  ;;  %v493_v13 = vld [vmem:[#allocation5 + $0x80] sm:$0xff]  ;;  %v502_v29 = vld [vmem:[#allocation5 + $0xc8] sm:$0xff]  ;;  %s1206_s15 = scalar_lea.hbm %s2214_s9, %s1342_s16 }
  0x2f   : > { %s1916_s21 = scalar_lea.vmem %s2205_s0, %s1327_s11  ;;  %v491_v16 = vld [vmem:[#allocation5 + $0x70] sm:$0xff]  ;;  %v489_v17 = vld [vmem:[#allocation5 + $0x60] sm:$0xff]  ;;  %v500_v30 = vld [vmem:[#allocation5 + $0xb8] sm:$0xff]  ;;  %s1207_s18 = sshll.u32 %s2139_s3, 4  ;;  %s1208_s18 = int_to_ptr.vmem [resolvable:$true] %s1207_s18 }
  0x30   : > { %v401_v2 = vld [vmem:[%s1916_s21 + $0x20] sm:$0xff]  ;;  %v402_v8 = vld [vmem:[%s1916_s21 + $0x28] sm:$0xff]  ;;  %1347 = vmatpush.msra.mxu2 %v503_v6  ;;  %517 = vmatpush.msra.mxu1 %v503_v6  ;;  %v403_v14 = vld [vmem:[%s1916_s21 + $0x30] sm:$0xff]  ;;  %s1195_s13 = scalar_lea.sflag [#allocation4], %s387_s28  ;;  %s1701_s23 = scalar_lea.hbm %s2214_s9, 128 }
  0x31   : > { %v397_v3 = vld [vmem:[%s1916_s21] sm:$0xff]  ;;  %1332 = vmatmul.msk.f32.vlgmr.msra.gmra.mxu3 %vm411_vm0, %v401_v2  ;;  %v398_v9 = vld [vmem:[%s1916_s21 + $0x8] sm:$0xff]  ;;  %v399_v15 = vld [vmem:[%s1916_s21 + $0x10] sm:$0xff] }
  0x32   : > { %1328 = vmatmul.msk.f32.vlgmr.msra.gmra.mxu0 %vm411_vm0, %v397_v3  ;;  %1348 = vmatpush.msra.mxu2 %v501_v7  ;;  %v487_v18 = vld [vmem:[#allocation5 + $0x50] sm:$0xff]  ;;  %v485_v19 = vld [vmem:[#allocation5 + $0x40] sm:$0xff]  ;;  %v498_v31 = vld [vmem:[#allocation5 + $0xa8] sm:$0xff] }
  0x33   : > { %518 = vmatpush.msra.mxu1 %v501_v7  ;;  %v404_v20 = vld [vmem:[%s1916_s21 + $0x38] sm:$0xff]  ;;  %v481_v23 = vld [vmem:[#allocation5 + $0x20] sm:$0xff]  ;;  %v494_v33 = vld [vmem:[#allocation5 + $0x88] sm:$0xff] }
  0x34   : > { %1349 = vmatpush.msra.mxu2 %v499_v10  ;;  %v400_v21 = vld [vmem:[%s1916_s21 + $0x18] sm:$0xff]  ;;  %v477_v25 = vld [vmem:[#allocation5] sm:$0xff]  ;;  %v490_v35 = vld [vmem:[#allocation5 + $0x68] sm:$0xff]  ;;  %s1209_s21 = sshll.u32 %s1206_s15, 4  ;;  %s1210_s21 = int_to_ptr.hbm [resolvable:$true] %s1209_s21 }
  0x35   : > { %519 = vmatpush.msra.mxu1 %v499_v10  ;;  %v483_v22 = vld [vmem:[#allocation5 + $0x30] sm:$0xff]  ;;  %v496_v32 = vld [vmem:[#allocation5 + $0x98] sm:$0xff]  ;;  %v486_v37 = vld [vmem:[#allocation5 + $0x48] sm:$0xff]  ;;  %s1695_s27 = sshra.s32 %s1210_s21, 4  ;;  %s1696_s27 = int_to_ptr.hbm [resolvable:$true] %s1695_s27 }
  0x36   : > { %1350 = vmatpush.msra.mxu2 %v497_v11  ;;  %v479_v24 = vld [vmem:[#allocation5 + $0x10] sm:$0xff]  ;;  %v492_v34 = vld [vmem:[#allocation5 + $0x78] sm:$0xff]  ;;  %v482_v40 = vld [vmem:[#allocation5 + $0x28] sm:$0xff]  ;;  %s1697_s14 = scalar_lea.hbm %s1696_s27, 64  ;;  %p1702_p3 = scmp.lt.s32.totalorder %s1696_s27, %s2214_s9 }
  0x37   : > { %520 = vmatpush.msra.mxu1 %v497_v11  ;;  %v488_v36 = vld [vmem:[#allocation5 + $0x58] sm:$0xff]  ;;  %v478_v44 = vld [vmem:[#allocation5 + $0x8] sm:$0xff]  ;;  %p1698_p0 = scmp.ne.s32.totalorder %s1696_s27, %s1697_s14  ;;  %p1703_p4 = scmp.lt.s32.totalorder %s1701_s23, %s1697_s14 }
  0x38   : > { %1351 = vmatpush.msra.mxu2 %v495_v12  ;;  %v1463_v38 = vld [vmem:[#allocation2] ss:$0 sm:$0xff]  ;;  %v690_v60 = vld [vmem:[#allocation8 + $0x168] sm:$0xff]  ;;  %v691_v61 = vld [vmem:[#allocation8 + $0x170] sm:$0xff] }
  0x39   : > { %1333 = vmatmul.msk.f32.gmra.mxu3 %vm411_vm0, %v402_v8  ;;  %521 = vmatpush.msra.mxu1 %v495_v12  ;;  %v484_v39 = vld [vmem:[#allocation5 + $0x38] sm:$0xff]  ;;  %v689_v62 = vld [vmem:[#allocation8 + $0x160] sm:$0xff]  ;;  %v686_v1 = vld [vmem:[#allocation8 + $0x148] sm:$0xff]  ;;  %p1699_p1 = pnand %p1698_p0, %p1855_p5  ;;  %p1704_p7 = por %p1703_p4, %p1702_p3 }
  0x3a   : > { %1329 = vmatmul.msk.f32.gmra.mxu0 %vm411_vm0, %v398_v9  ;;  %1352 = vmatpush.msra.mxu2 %v493_v13  ;;  %v480_v43 = vld [vmem:[#allocation5 + $0x18] sm:$0xff]  ;;  %v685_v3 = vld [vmem:[#allocation8 + $0x140] sm:$0xff]  ;;  %v682_v6 = vld [vmem:[#allocation8 + $0x128] sm:$0xff] }
  0x3b   : > { %522 = vmatpush.msra.mxu1 %v493_v13  ;;  %v692_v59 = vld [vmem:[#allocation8 + $0x178] sm:$0xff]  ;;  %701 = vmatpush.msrb.mxu3 %v690_v60  ;;  %v687_v63 = vld [vmem:[#allocation8 + $0x150] sm:$0xff]  ;;  %v681_v5 = vld [vmem:[#allocation8 + $0x120] sm:$0xff]  ;;  %p1700_p2 = pneg %p1699_p1 }
  0x3c   : > { %1353 = vmatpush.msra.mxu2 %v491_v16  ;;  %v688_v0 = vld [vmem:[#allocation8 + $0x158] sm:$0xff]  ;;  %742 = vmatpush.msrb.mxu0 %v691_v61  ;;  %v683_v4 = vld [vmem:[#allocation8 + $0x130] sm:$0xff]  ;;  %v678_v8 = vld [vmem:[#allocation8 + $0x108] sm:$0xff] }
  0x3d   : > { %523 = vmatpush.msra.mxu1 %v491_v16  ;;  %v684_v2 = vld [vmem:[#allocation8 + $0x138] sm:$0xff]  ;;  %702 = vmatpush.msrb.mxu3 %v687_v63  ;;  %v679_v9 = vld [vmem:[#allocation8 + $0x110] sm:$0xff]  ;;  %v677_v10 = vld [vmem:[#allocation8 + $0x100] sm:$0xff]  ;;  %p1705_p8 = pnand %p1704_p7, %p1700_p2 }
  0x3e   : > { %1354 = vmatpush.msra.mxu2 %v489_v17  ;;  %743 = vmatpush.msrb.mxu0 %v688_v0  ;;  %v680_v7 = vld [vmem:[#allocation8 + $0x118] sm:$0xff]  ;;  %v675_v11 = vld [vmem:[#allocation8 + $0xf0] sm:$0xff]  ;;  %v674_v13 = vld [vmem:[#allocation8 + $0xe8] sm:$0xff] }
  0x3f   : > { %524 = vmatpush.msra.mxu1 %v489_v17  ;;  %703 = vmatpush.msrb.mxu3 %v684_v2  ;;  %v676_v12 = vld [vmem:[#allocation8 + $0xf8] sm:$0xff]  ;;  %v671_v17 = vld [vmem:[#allocation8 + $0xd0] sm:$0xff] }
  0x40   : > { %1355 = vmatpush.msra.mxu2 %v487_v18  ;;  %744 = vmatpush.msrb.mxu0 %v685_v3 }
  0x41   : > { %1334 = vmatmul.msk.f32.gmra.mxu3 %vm411_vm0, %v403_v14  ;;  %525 = vmatpush.msra.mxu1 %v487_v18  ;;  %v672_v14 = vld [vmem:[#allocation8 + $0xd8] sm:$0xff]  ;;  %v669_v18 = vld [vmem:[#allocation8 + $0xc0] sm:$0xff] }
  0x42   : > { %1330 = vmatmul.msk.f32.gmra.mxu0 %vm411_vm0, %v399_v15  ;;  %1356 = vmatpush.msra.mxu2 %v485_v19  ;;  %v673_v15 = vld [vmem:[#allocation8 + $0xe0] sm:$0xff] }
  0x43   : > { %526 = vmatpush.msra.mxu1 %v485_v19  ;;  %704 = vmatpush.msrb.mxu3 %v681_v5  ;;  %v670_v19 = vld [vmem:[#allocation8 + $0xc8] sm:$0xff] }
  0x44   : > { %1357 = vmatpush.msra.mxu2 %v483_v22  ;;  %745 = vmatpush.msrb.mxu0 %v682_v6 }
  0x45   : > { %527 = vmatpush.msra.mxu1 %v483_v22  ;;  %705 = vmatpush.msrb.mxu3 %v678_v8  ;;  %v667_v22 = vld [vmem:[#allocation8 + $0xb0] sm:$0xff] }
  0x46   : > { %1358 = vmatpush.msra.mxu2 %v481_v23  ;;  %746 = vmatpush.msrb.mxu0 %v679_v9 }
  0x47   : > { %528 = vmatpush.msra.mxu1 %v481_v23  ;;  %706 = vmatpush.msrb.mxu3 %v675_v11  ;;  %v665_v23 = vld [vmem:[#allocation8 + $0xa0] sm:$0xff] }
  0x48   : > { %1359 = vmatpush.msra.mxu2 %v479_v24  ;;  %747 = vmatpush.msrb.mxu0 %v676_v12 }
  0x49   : > { %1335 = vmatmul.msk.f32.gmra.mxu3 %vm411_vm0, %v404_v20  ;;  %529 = vmatpush.msra.mxu1 %v479_v24  ;;  %v668_v20 = vld [vmem:[#allocation8 + $0xb8] sm:$0xff]  ;;  %v663_v24 = vld [vmem:[#allocation8 + $0x90] sm:$0xff] }
  0x4a   : > { %1331 = vmatmul.msk.f32.gmra.mxu0 %vm411_vm0, %v400_v21  ;;  %1360 = vmatpush.msra.mxu2 %v477_v25  ;;  %v666_v21 = vld [vmem:[#allocation8 + $0xa8] sm:$0xff] }
  0x4b   : > { %530 = vmatpush.msra.mxu1 %v477_v25  ;;  %707 = vmatpush.msrb.mxu3 %v672_v14  ;;  %v664_v25 = vld [vmem:[#allocation8 + $0x98] sm:$0xff] }
  0x4c   : > { %556 = vmatpush.msrb.mxu2 %v508_v26  ;;  %748 = vmatpush.msrb.mxu0 %v673_v15  ;;  %v662_v26 = vld [vmem:[#allocation8 + $0x88] sm:$0xff] }
  0x4d   : > { %783 = vmatpush.msrb.mxu1 %v692_v59  ;;  %708 = vmatpush.msrb.mxu3 %v669_v18 }
  0x4e   : > { %557 = vmatpush.msrb.mxu2 %v506_v27  ;;  %749 = vmatpush.msrb.mxu0 %v670_v19  ;;  %v660_v27 = vld [vmem:[#allocation8 + $0x78] sm:$0xff] }
  0x4f   : > { %784 = vmatpush.msrb.mxu1 %v689_v62  ;;  %709 = vmatpush.msrb.mxu3 %v666_v21 }
  0x50   : > { %558 = vmatpush.msrb.mxu2 %v504_v28  ;;  %750 = vmatpush.msrb.mxu0 %v667_v22  ;;  %v661_v28 = vld [vmem:[#allocation8 + $0x80] sm:$0xff] }
  0x51   : > { %785 = vmatpush.msrb.mxu1 %v686_v1  ;;  %710 = vmatpush.msrb.mxu3 %v663_v24 }
  0x52   : > { %559 = vmatpush.msrb.mxu2 %v502_v29  ;;  %751 = vmatpush.msrb.mxu0 %v664_v25 }
  0x53   : > { %786 = vmatpush.msrb.mxu1 %v683_v4  ;;  %711 = vmatpush.msrb.mxu3 %v660_v27 }
  0x54   : > { %560 = vmatpush.msrb.mxu2 %v500_v30  ;;  %752 = vmatpush.msrb.mxu0 %v661_v28  ;;  %v659_v30 = vld [vmem:[#allocation8 + $0x70] sm:$0xff] }
  0x55   : > { %787 = vmatpush.msrb.mxu1 %v680_v7 }
  0x56   : > { %561 = vmatpush.msrb.mxu2 %v498_v31  ;;  %v657_v31 = vld [vmem:[#allocation8 + $0x60] sm:$0xff] }
  0x57   : > { %788 = vmatpush.msrb.mxu1 %v677_v10  ;;  %712 = vmatpush.msrb.mxu3 %v657_v31 }
  0x58   : > { %562 = vmatpush.msrb.mxu2 %v496_v32  ;;  %v658_v32 = vld [vmem:[#allocation8 + $0x68] sm:$0xff] }
  0x59   : > { %789 = vmatpush.msrb.mxu1 %v674_v13  ;;  %753 = vmatpush.msrb.mxu0 %v658_v32 }
  0x5a   : > { %563 = vmatpush.msrb.mxu2 %v494_v33  ;;  %v656_v33 = vld [vmem:[#allocation8 + $0x58] sm:$0xff] }
  0x5b   : > { %790 = vmatpush.msrb.mxu1 %v671_v17 }
  0x5c   : > { %564 = vmatpush.msrb.mxu2 %v492_v34  ;;  %v654_v34 = vld [vmem:[#allocation8 + $0x48] sm:$0xff] }
  0x5d   : > { %791 = vmatpush.msrb.mxu1 %v668_v20  ;;  %713 = vmatpush.msrb.mxu3 %v654_v34 }
  0x5e   : > { %565 = vmatpush.msrb.mxu2 %v490_v35  ;;  %v655_v35 = vld [vmem:[#allocation8 + $0x50] sm:$0xff] }
  0x5f   : > { %792 = vmatpush.msrb.mxu1 %v665_v23  ;;  %754 = vmatpush.msrb.mxu0 %v655_v35 }
  0x60   : > { %566 = vmatpush.msrb.mxu2 %v488_v36  ;;  %v653_v36 = vld [vmem:[#allocation8 + $0x40] sm:$0xff] }
  0x61   : > { %793 = vmatpush.msrb.mxu1 %v662_v26 }
  0x62   : > { %567 = vmatpush.msrb.mxu2 %v486_v37  ;;  %v651_v37 = vld [vmem:[#allocation8 + $0x30] sm:$0xff] }
  0x63   : > { %794 = vmatpush.msrb.mxu1 %v659_v30  ;;  %714 = vmatpush.msrb.mxu3 %v651_v37 }
  0x64   : > { %568 = vmatpush.msrb.mxu2 %v484_v39  ;;  %v650_v39 = vld [vmem:[#allocation8 + $0x28] sm:$0xff] }
  0x65   : > { %795 = vmatpush.msrb.mxu1 %v656_v33 }
  0x66   : > { %569 = vmatpush.msrb.mxu2 %v482_v40  ;;  %v648_v40 = vld [vmem:[#allocation8 + $0x18] sm:$0xff] }
  0x67   : > { %796 = vmatpush.msrb.mxu1 %v653_v36  ;;  %715 = vmatpush.msrb.mxu3 %v648_v40 }
  0x68   : > { %570 = vmatpush.msrb.mxu2 %v480_v43 }
  0x69   : > { %797 = vmatpush.msrb.mxu1 %v650_v39 }
  0x6a   : > { %571 = vmatpush.msrb.mxu2 %v478_v44  ;;  %v647_v44 = vld [vmem:[#allocation8 + $0x10] sm:$0xff] }
  0x6b   : > { %798 = vmatpush.msrb.mxu1 %v647_v44 }
  0xaf   : > { %v453_v41 = vpop.f32.mrf.mxu0 }
  0xb0   : > { %v1940_v42 = vadd.f32 %v1463_v38, %v453_v41  ;;  %v649_v41 = vld [vmem:[#allocation8 + $0x20] sm:$0xff] }
  0xb2   : > { %531 = vmatmul.f32.vlgmr.msra.gmra.mxu1 %v1940_v42 }
  0xb4   : > { %v465_v45 = vpop.f32.mrf.mxu3 }
  0xb5   : > { %v1943_v46 = vadd.f32 %v1463_v38, %v465_v45  ;;  %v645_v45 = vld [vmem:[#allocation8] sm:$0xff] }
  0xb6   : > { %716 = vmatpush.msrb.mxu3 %v645_v45 }
  0xb7   : > { %543 = vmatmul.f32.vlgmr.msra.gmra.mxu2 %v1943_v46  ;;  %v456_v47 = vpop.f32.mrf.mxu0 }
  0xb8   : > { %v1946_v48 = vadd.f32 %v1463_v38, %v456_v47  ;;  %v646_v47 = vld [vmem:[#allocation8 + $0x8] sm:$0xff] }
  0xba   : > { %534 = vmatmul.f32.gmra.mxu1 %v1946_v48 }
  0xbc   : > { %v468_v49 = vpop.f32.mrf.mxu3 }
  0xbd   : > { %v1949_v50 = vadd.f32 %v1463_v38, %v468_v49 }
  0xbf   : > { %546 = vmatmul.f32.gmra.mxu2 %v1949_v50  ;;  %v459_v51 = vpop.f32.mrf.mxu0 }
  0xc0   : > { %v1952_v52 = vadd.f32 %v1463_v38, %v459_v51  ;;  %v509_v51 = vld [vmem:[#allocation7] sm:$0x3] }
  0xc1   : > { %v1983_v60 = vperm.slane %v509_v51, 0 }
  0xc2   : > { %537 = vmatmul.f32.gmra.mxu1 %v1952_v52 }
  0xc4   : > { %v471_v53 = vpop.f32.mrf.mxu3 }
  0xc5   : > { %v1955_v54 = vadd.f32 %v1463_v38, %v471_v53 }
  0xc7   : > { %549 = vmatmul.f32.gmra.mxu2 %v1955_v54  ;;  %v462_v55 = vpop.f32.mrf.mxu0 }
  0xc8   : > { %v1958_v56 = vadd.f32 %v1463_v38, %v462_v55  ;;  %v1980_v55 = vperm.slane %v509_v51, 1  ;;  %v928_v51 = vld [vmem:[#allocation8 + $0x2f8] sm:$0xff] }
  0xca   : > { %540 = vmatmul.f32.gmra.mxu1 %v1958_v56 }
  0xcc   : > { %v474_v57 = vpop.f32.mrf.mxu3 }
  0xcd   : > { %v1961_v58 = vadd.f32 %v1463_v38, %v474_v57  ;;  %v652_v38 = vld [vmem:[#allocation8 + $0x38] sm:$0xff] }
  0xce   : > { %755 = vmatpush.msrb.mxu0 %v652_v38 }
  0xcf   : > { %552 = vmatmul.f32.gmra.mxu2 %v1961_v58 }
  0xd0   : > { %756 = vmatpush.msrb.mxu0 %v649_v41 }
  0xd2   : > { %757 = vmatpush.msrb.mxu0 %v646_v47  ;;  %v927_v47 = vld [vmem:[#allocation8 + $0x2f0] sm:$0xff] }
  0xd3   : > { %979 = vmatpush.msra.mxu3 %v927_v47 }
  0xd4   : > { %1020 = vmatpush.msra.mxu0 %v928_v51 }
  0xd7   : > { %572 = vmatmul.f32.vlgmr.msrb.gmra.mxu2 %v1940_v42 }
  0xdf   : > { %575 = vmatmul.f32.gmra.mxu2 %v1946_v48 }
  0xe7   : > { %578 = vmatmul.f32.gmra.mxu2 %v1952_v52 }
  0xef   : > { %581 = vmatmul.f32.gmra.mxu2 %v1958_v56 }
  0xf7   : > { %584 = vmatmul.f32.gmra.mxu2 %v1943_v46 }
  0xff   : > { %587 = vmatmul.f32.gmra.mxu2 %v1949_v50 }
 0x107   : > { %590 = vmatmul.f32.gmra.mxu2 %v1955_v54 }
 0x10f   : > { %593 = vmatmul.f32.gmra.mxu2 %v1961_v58 }
 0x12f   : > { %v532_v53 = vpop.f32.mrf.mxu1 }
 0x130   : > { %v533_v62 = vadd.f32 %v532_v53, %v1983_v60  ;;  %v924_v53 = vld [vmem:[#allocation8 + $0x2d8] sm:$0xff] }
 0x131   : > { %980 = vmatpush.msra.mxu3 %v924_v53 }
 0x137   : > { %v535_v63 = vpop.f32.mrf.mxu1 }
 0x138   : > { %v536_v5 = vadd.f32 %v535_v63, %v1983_v60 }
 0x13a   : > { %v1972_v16 = vpop.f32.mrf.mxu2 }
 0x13b   : > { %v545_v36 = vadd.f32 %v1972_v16, %v1983_v60  ;;  %v925_v16 = vld [vmem:[#allocation8 + $0x2e0] sm:$0xff] }
 0x13c   : > { %1021 = vmatpush.msra.mxu0 %v925_v16  ;;  %v902_v16 = vld [vmem:[#allocation8 + $0x228] sm:$0xff] }
 0x13f   : > { %v538_v8 = vpop.f32.mrf.mxu1 }
 0x140   : > { %v539_v15 = vadd.f32 %v538_v8, %v1983_v60 }
 0x142   : > { %v1974_v29 = vpop.f32.mrf.mxu2 }
 0x147   : > { %v541_v22 = vpop.f32.mrf.mxu1 }
 0x148   : > { %v542_v26 = vadd.f32 %v541_v22, %v1983_v60  ;;  %v910_v22 = vld [vmem:[#allocation8 + $0x268] sm:$0xff] }
 0x14a   : > { %v1976_v43 = vpop.f32.mrf.mxu2 }
 0x152   : > { %v1978_v49 = vpop.f32.mrf.mxu2 }
 0x15a   : > { %v573_v57 = vpop.f32.mrf.mxu2 }
 0x15b   : > { %v574_v59 = vadd.f32 %v573_v57, %v1980_v55 }
 0x15d   : > { %v605_v61 = vmul.f32 0.5, %v574_v59  ;;  %v548_v59 = vadd.f32 %v1974_v29, %v1983_v60  ;;  %v915_v29 = vld [vmem:[#allocation8 + $0x290] sm:$0xff] }
 0x15f   : > { %1465 = vtanh.f32 %v605_v61  ;;  %v921_v61 = vld [vmem:[#allocation8 + $0x2c0] sm:$0xff] }
 0x160   : > { %1467 = vtanh.f32 %v533_v62  ;;  %v922_v62 = vld [vmem:[#allocation8 + $0x2c8] sm:$0xff]  ;;  %981 = vmatpush.msra.mxu3 %v921_v61  ;;  %v896_v61 = vld [vmem:[#allocation8 + $0x1f8] sm:$0xff] }
 0x161   : > { %1022 = vmatpush.msra.mxu0 %v922_v62  ;;  %v893_v62 = vld [vmem:[#allocation8 + $0x1e0] sm:$0xff] }
 0x162   : > { %v576_v0 = vpop.f32.mrf.mxu2 }
 0x163   : > { %v577_v1 = vadd.f32 %v576_v0, %v1980_v55 }
 0x165   : > { %v1466_v2 = vpop.eup %1465  ;;  %v606_v3 = vmul.f32 0.5, %v577_v1 }
 0x166   : > { %v621_v4 = vmul.f32 0.5, %v1466_v2  ;;  %v1468_v7 = vpop.eup %1467 }
 0x167   : > { %1469 = vtanh.f32 %v606_v3  ;;  %v918_v3 = vld [vmem:[#allocation8 + $0x2a8] sm:$0xff] }
 0x168   : > { %v629_v6 = vadd.f32 0.5, %v621_v4  ;;  %1471 = vtanh.f32 %v536_v5  ;;  %v919_v5 = vld [vmem:[#allocation8 + $0x2b0] sm:$0xff]  ;;  %982 = vmatpush.msra.mxu3 %v918_v3  ;;  %v889_v3 = vld [vmem:[#allocation8 + $0x1c0] sm:$0xff] }
 0x169   : > { %1023 = vmatpush.msra.mxu0 %v919_v5  ;;  %v885_v5 = vld [vmem:[#allocation8 + $0x1a0] sm:$0xff] }
 0x16a   : > { %v579_v9 = vpop.f32.mrf.mxu2  ;;  %v637_v10 = vmul.f32 %v1468_v7, %v629_v6  ;;  %v926_v6 = vld [vmem:[#allocation8 + $0x2e8] sm:$0xff]  ;;  %983 = vmatpush.msra.mxu3 %v915_v29  ;;  %v884_v29 = vld [vmem:[#allocation8 + $0x198] sm:$0xff] }
 0x16b   : > { %v580_v11 = vadd.f32 %v579_v9, %v1980_v55  ;;  %v916_v9 = vld [vmem:[#allocation8 + $0x298] sm:$0xff]  ;;  %938 = vmatpush.msra.mxu2 %v926_v6  ;;  %v886_v6 = vld [vmem:[#allocation8 + $0x1a8] sm:$0xff] }
 0x16c   : > { %717 = vmatmul.f32.vlgmr.msrb.gmra.mxu3 %v637_v10  ;;  %758 = vmatmul.f32.vlgmr.msrb.gmra.mxu0 %v637_v10 }
 0x16d   : > { %v1470_v12 = vpop.eup %1469  ;;  %v607_v13 = vmul.f32 0.5, %v580_v11  ;;  %799 = vmatmul.f32.vlgmr.msrb.gmra.mxu1 %v637_v10  ;;  %v923_v10 = vld [vmem:[#allocation8 + $0x2d0] sm:$0xff]  ;;  %1024 = vmatpush.msra.mxu0 %v916_v9  ;;  %v881_v9 = vld [vmem:[#allocation8 + $0x180] sm:$0xff] }
 0x16e   : > { %v622_v14 = vmul.f32 0.5, %v1470_v12  ;;  %v1472_v18 = vpop.eup %1471  ;;  %v912_v12 = vld [vmem:[#allocation8 + $0x278] sm:$0xff]  ;;  %939 = vmatpush.msra.mxu2 %v923_v10 }
 0x16f   : > { %1473 = vtanh.f32 %v607_v13  ;;  %v551_v13 = vadd.f32 %v1976_v43, %v1983_v60  ;;  %984 = vmatpush.msra.mxu3 %v912_v12  ;;  %v906_v43 = vld [vmem:[#allocation8 + $0x248] sm:$0xff]  ;;  %v693_v10 = vld [vmem:[%s2211_s6] sm:$0x7] }
 0x170   : > { %v630_v17 = vadd.f32 0.5, %v622_v14  ;;  %1475 = vtanh.f32 %v539_v15  ;;  %v913_v14 = vld [vmem:[#allocation8 + $0x280] sm:$0xff]  ;;  %v920_v15 = vld [vmem:[#allocation8 + $0x2b8] sm:$0xff] }
 0x171   : > { %1025 = vmatpush.msra.mxu0 %v913_v14  ;;  %940 = vmatpush.msra.mxu2 %v920_v15  ;;  %v2009_v14 = vperm.slane %v693_v10, 1 }
 0x172   : > { %v582_v19 = vpop.f32.mrf.mxu2  ;;  %v638_v20 = vmul.f32 %v1472_v18, %v630_v17  ;;  %v909_v18 = vld [vmem:[#allocation8 + $0x260] sm:$0xff] }
 0x173   : > { %v583_v21 = vadd.f32 %v582_v19, %v1980_v55  ;;  %985 = vmatpush.msra.mxu3 %v909_v18  ;;  %1026 = vmatpush.msra.mxu0 %v910_v22 }
 0x174   : > { %720 = vmatmul.f32.gmra.mxu3 %v638_v20  ;;  %761 = vmatmul.f32.gmra.mxu0 %v638_v20 }
 0x175   : > { %v1474_v23 = vpop.eup %1473  ;;  %v608_v24 = vmul.f32 0.5, %v583_v21  ;;  %802 = vmatmul.f32.gmra.mxu1 %v638_v20  ;;  %986 = vmatpush.msra.mxu3 %v906_v43 }
 0x176   : > { %v623_v25 = vmul.f32 0.5, %v1474_v23  ;;  %v1476_v28 = vpop.eup %1475 }
 0x177   : > { %1477 = vtanh.f32 %v608_v24  ;;  %v917_v24 = vld [vmem:[#allocation8 + $0x2a0] sm:$0xff] }
 0x178   : > { %v631_v27 = vadd.f32 0.5, %v623_v25  ;;  %1479 = vtanh.f32 %v542_v26  ;;  %v907_v25 = vld [vmem:[#allocation8 + $0x250] sm:$0xff]  ;;  %941 = vmatpush.msra.mxu2 %v917_v24 }
 0x179   : > { %1027 = vmatpush.msra.mxu0 %v907_v25 }
 0x17a   : > { %v585_v30 = vpop.f32.mrf.mxu2  ;;  %v639_v31 = vmul.f32 %v1476_v28, %v631_v27  ;;  %v903_v28 = vld [vmem:[#allocation8 + $0x230] sm:$0xff] }
 0x17b   : > { %v586_v32 = vadd.f32 %v585_v30, %v1980_v55  ;;  %v914_v30 = vld [vmem:[#allocation8 + $0x288] sm:$0xff]  ;;  %987 = vmatpush.msra.mxu3 %v903_v28 }
 0x17c   : > { %723 = vmatmul.f32.gmra.mxu3 %v639_v31  ;;  %764 = vmatmul.f32.gmra.mxu0 %v639_v31 }
 0x17d   : > { %v1478_v33 = vpop.eup %1477  ;;  %v609_v34 = vmul.f32 0.5, %v586_v32  ;;  %805 = vmatmul.f32.gmra.mxu1 %v639_v31  ;;  %v904_v32 = vld [vmem:[#allocation8 + $0x238] sm:$0xff]  ;;  %942 = vmatpush.msra.mxu2 %v914_v30 }
 0x17e   : > { %v624_v35 = vmul.f32 0.5, %v1478_v33  ;;  %v1480_v38 = vpop.eup %1479  ;;  %v554_v33 = vadd.f32 %v1978_v49, %v1983_v60  ;;  %1028 = vmatpush.msra.mxu0 %v904_v32  ;;  %v894_v49 = vld [vmem:[#allocation8 + $0x1e8] sm:$0xff] }
 0x17f   : > { %1481 = vtanh.f32 %v609_v34  ;;  %v911_v34 = vld [vmem:[#allocation8 + $0x270] sm:$0xff] }
 0x180   : > { %v632_v37 = vadd.f32 0.5, %v624_v35  ;;  %1483 = vtanh.f32 %v545_v36  ;;  %v901_v36 = vld [vmem:[#allocation8 + $0x220] sm:$0xff]  ;;  %943 = vmatpush.msra.mxu2 %v911_v34 }
 0x181   : > { %1029 = vmatpush.msra.mxu0 %v901_v36 }
 0x182   : > { %v588_v39 = vpop.f32.mrf.mxu2  ;;  %v640_v40 = vmul.f32 %v1480_v38, %v632_v37 }
 0x183   : > { %v589_v41 = vadd.f32 %v588_v39, %v1980_v55  ;;  %v897_v39 = vld [vmem:[#allocation8 + $0x200] sm:$0xff] }
 0x184   : > { %726 = vmatmul.f32.gmra.mxu3 %v640_v40  ;;  %767 = vmatmul.f32.gmra.mxu0 %v640_v40 }
 0x185   : > { %v1482_v44 = vpop.eup %1481  ;;  %v610_v45 = vmul.f32 0.5, %v589_v41  ;;  %808 = vmatmul.f32.gmra.mxu1 %v640_v40  ;;  %v898_v40 = vld [vmem:[#allocation8 + $0x208] sm:$0xff]  ;;  %v908_v41 = vld [vmem:[#allocation8 + $0x258] sm:$0xff] }
 0x186   : > { %v625_v57 = vmul.f32 0.5, %v1482_v44  ;;  %v1484_v0 = vpop.eup %1483  ;;  %v895_v44 = vld [vmem:[#allocation8 + $0x1f0] sm:$0xff]  ;;  %1030 = vmatpush.msra.mxu0 %v898_v40  ;;  %944 = vmatpush.msra.mxu2 %v908_v41 }
 0x187   : > { %1485 = vtanh.f32 %v610_v45 }
 0x188   : > { %v633_v63 = vadd.f32 0.5, %v625_v57  ;;  %1487 = vtanh.f32 %v548_v59  ;;  %1031 = vmatpush.msra.mxu0 %v895_v44  ;;  %v905_v57 = vld [vmem:[#allocation8 + $0x240] sm:$0xff]  ;;  %v899_v59 = vld [vmem:[#allocation8 + $0x210] sm:$0xff] }
 0x189   : > { %945 = vmatpush.msra.mxu2 %v905_v57 }
 0x18a   : > { %v591_v1 = vpop.f32.mrf.mxu2  ;;  %v641_v2 = vmul.f32 %v1484_v0, %v633_v63  ;;  %v891_v63 = vld [vmem:[#allocation8 + $0x1d0] sm:$0xff]  ;;  %v892_v0 = vld [vmem:[#allocation8 + $0x1d8] sm:$0xff] }
 0x18b   : > { %v592_v4 = vadd.f32 %v591_v1, %v1980_v55  ;;  %946 = vmatpush.msra.mxu2 %v902_v16  ;;  %v890_v1 = vld [vmem:[#allocation8 + $0x1c8] sm:$0xff]  ;;  %1032 = vmatpush.msra.mxu0 %v892_v0 }
 0x18c   : > { %729 = vmatmul.f32.gmra.mxu3 %v641_v2  ;;  %770 = vmatmul.f32.gmra.mxu0 %v641_v2 }
 0x18d   : > { %v1486_v7 = vpop.eup %1485  ;;  %v611_v8 = vmul.f32 0.5, %v592_v4  ;;  %811 = vmatmul.f32.gmra.mxu1 %v641_v2  ;;  %947 = vmatpush.msra.mxu2 %v899_v59  ;;  %v888_v2 = vld [vmem:[#allocation8 + $0x1b8] sm:$0xff]  ;;  %v887_v4 = vld [vmem:[#allocation8 + $0x1b0] sm:$0xff] }
 0x18e   : > { %v626_v11 = vmul.f32 0.5, %v1486_v7  ;;  %v1488_v19 = vpop.eup %1487  ;;  %1033 = vmatpush.msra.mxu0 %v889_v3  ;;  %v882_v7 = vld [vmem:[#allocation8 + $0x188] sm:$0xff] }
 0x18f   : > { %1489 = vtanh.f32 %v611_v8  ;;  %948 = vmatpush.msra.mxu2 %v896_v61  ;;  %v883_v8 = vld [vmem:[#allocation8 + $0x190] sm:$0xff] }
 0x190   : > { %v634_v17 = vadd.f32 0.5, %v626_v11  ;;  %1491 = vtanh.f32 %v551_v13  ;;  %1034 = vmatpush.msra.mxu0 %v886_v6  ;;  %v2007_v11 = vperm.slane %v693_v10, 2 }
 0x191   : > { %949 = vmatpush.msra.mxu2 %v893_v62 }
 0x192   : > { %v594_v20 = vpop.f32.mrf.mxu2  ;;  %v642_v21 = vmul.f32 %v1488_v19, %v634_v17  ;;  %1035 = vmatpush.msra.mxu0 %v883_v8  ;;  %v2012_v17 = vperm.slane %v693_v10, 0 }
 0x193   : > { %v595_v23 = vadd.f32 %v594_v20, %v1980_v55  ;;  %v900_v55 = vld [vmem:[#allocation8 + $0x218] sm:$0xff]  ;;  %950 = vmatpush.msra.mxu2 %v890_v1 }
 0x194   : > { %732 = vmatmul.f32.gmra.mxu3 %v642_v21  ;;  %773 = vmatmul.f32.gmra.mxu0 %v642_v21 }
 0x195   : > { %v1490_v26 = vpop.eup %1489  ;;  %v612_v27 = vmul.f32 0.5, %v595_v23  ;;  %814 = vmatmul.f32.gmra.mxu1 %v642_v21  ;;  %988 = vmatpush.msra.mxu3 %v900_v55 }
 0x196   : > { %v627_v31 = vmul.f32 0.5, %v1490_v26  ;;  %v1492_v37 = vpop.eup %1491  ;;  %951 = vmatpush.msra.mxu2 %v887_v4 }
 0x197   : > { %1493 = vtanh.f32 %v612_v27  ;;  %989 = vmatpush.msra.mxu3 %v897_v39 }
 0x198   : > { %v635_v35 = vadd.f32 0.5, %v627_v31  ;;  %1495 = vtanh.f32 %v554_v33  ;;  %952 = vmatpush.msra.mxu2 %v884_v29 }
 0x199   : > { %990 = vmatpush.msra.mxu3 %v894_v49 }
 0x19a   : > { %v643_v38 = vmul.f32 %v1492_v37, %v635_v35  ;;  %953 = vmatpush.msra.mxu2 %v881_v9 }
 0x19b   : > { %991 = vmatpush.msra.mxu3 %v891_v63 }
 0x19c   : > { %735 = vmatmul.f32.gmra.mxu3 %v643_v38  ;;  %776 = vmatmul.f32.gmra.mxu0 %v643_v38 }
 0x19d   : > { %v1494_v60 = vpop.eup %1493  ;;  %817 = vmatmul.f32.gmra.mxu1 %v643_v38  ;;  %992 = vmatpush.msra.mxu3 %v888_v2 }
 0x19e   : > { %v628_v45 = vmul.f32 0.5, %v1494_v60  ;;  %v1496_v51 = vpop.eup %1495 }
 0x19f   : > { %993 = vmatpush.msra.mxu3 %v885_v5 }
 0x1a0   : > { %v636_v47 = vadd.f32 0.5, %v628_v45 }
 0x1a1   : > { %994 = vmatpush.msra.mxu3 %v882_v7 }
 0x1a2   : > { %v644_v53 = vmul.f32 %v1496_v51, %v636_v47 }
 0x1a4   : > { %738 = vmatmul.f32.gmra.mxu3 %v644_v53  ;;  %779 = vmatmul.f32.gmra.mxu0 %v644_v53 }
 0x1a5   : > { %820 = vmatmul.f32.gmra.mxu1 %v644_v53 }
 0x1e9   : > { %v759_v12 = vpop.f32.mrf.mxu0 }
 0x1ea   : > { %v800_v13 = vpop.f32.mrf.mxu1  ;;  %v760_v19 = vadd.f32 %v759_v12, %v2009_v14 }
 0x1eb   : > { %v801_v15 = vadd.f32 %v800_v13, %v2007_v11 }
 0x1ed   : > { %v840_v18 = vmul.f32 0.5, %v801_v15 }
 0x1ef   : > { %1497 = vtanh.f32 %v840_v18  ;;  %v718_v20 = vpop.f32.mrf.mxu3 }
 0x1f0   : > { %v2016_v21 = vadd.f32 %v718_v20, %v2012_v17  ;;  %1499 = vtanh.f32 %v760_v19 }
 0x1f1   : > { %v762_v22 = vpop.f32.mrf.mxu0 }
 0x1f2   : > { %v803_v23 = vpop.f32.mrf.mxu1  ;;  %v763_v27 = vadd.f32 %v762_v22, %v2009_v14 }
 0x1f3   : > { %v804_v43 = vadd.f32 %v803_v23, %v2007_v11  ;;  %v1132_v23 = vld [vmem:[%s2212_s7 + $0x78] sm:$0xff] }
 0x1f4   : > { %1361 = vmatpush.msra.mxu1 %v1132_v23  ;;  %1137 = vmatpush.msrb.mxu0 %v1132_v23  ;;  %v2101_v23 = vld [vmem:[%s2211_s6 + $0x3] sm:$0x7] }
 0x1f5   : > { %v1498_v24 = vpop.eup %1497  ;;  %v841_v25 = vmul.f32 0.5, %v804_v43  ;;  %v1131_v43 = vld [vmem:[%s2212_s7 + $0x70] sm:$0xff] }
 0x1f6   : > { %v856_v26 = vmul.f32 0.5, %v1498_v24  ;;  %v1500_v32 = vpop.eup %1499  ;;  %1362 = vmatpush.msra.mxu1 %v1131_v43  ;;  %1138 = vmatpush.msrb.mxu0 %v1131_v43 }
 0x1f7   : > { %1501 = vtanh.f32 %v841_v25  ;;  %v721_v28 = vpop.f32.mrf.mxu3 }
 0x1f8   : > { %v864_v30 = vadd.f32 0.5, %v856_v26  ;;  %v2021_v31 = vadd.f32 %v721_v28, %v2012_v17  ;;  %1503 = vtanh.f32 %v763_v27  ;;  %v1130_v27 = vld [vmem:[%s2212_s7 + $0x68] sm:$0xff] }
 0x1f9   : > { %v765_v33 = vpop.f32.mrf.mxu0  ;;  %1363 = vmatpush.msra.mxu1 %v1130_v27  ;;  %1139 = vmatpush.msrb.mxu0 %v1130_v27  ;;  %v2110_v27 = vperm.slane %v2101_v23, 1 }
 0x1fa   : > { %v872_v55 = vmul.f32 %v1500_v32, %v864_v30  ;;  %v806_v34 = vpop.f32.mrf.mxu1  ;;  %v766_v39 = vadd.f32 %v765_v33, %v2009_v14 }
 0x1fb   : > { %v807_v35 = vadd.f32 %v806_v34, %v2007_v11 }
 0x1fc   : > { %954 = vmatmul.f32.vlgmr.msra.gmra.mxu2 %v872_v55  ;;  %995 = vmatmul.f32.vlgmr.msra.gmra.mxu3 %v872_v55 }
 0x1fd   : > { %v1502_v36 = vpop.eup %1501  ;;  %v842_v37 = vmul.f32 0.5, %v807_v35  ;;  %1036 = vmatmul.f32.vlgmr.msra.gmra.mxu0 %v872_v55 }
 0x1fe   : > { %v857_v38 = vmul.f32 0.5, %v1502_v36  ;;  %v1504_v60 = vpop.eup %1503  ;;  %v1129_v36 = vld [vmem:[%s2212_s7 + $0x60] sm:$0xff] }
 0x1ff   : > { %1505 = vtanh.f32 %v842_v37  ;;  %v724_v40 = vpop.f32.mrf.mxu3  ;;  %1364 = vmatpush.msra.mxu1 %v1129_v36  ;;  %1140 = vmatpush.msrb.mxu0 %v1129_v36 }
 0x200   : > { %v865_v41 = vadd.f32 0.5, %v857_v38  ;;  %v2026_v49 = vadd.f32 %v724_v40, %v2012_v17  ;;  %1507 = vtanh.f32 %v766_v39  ;;  %v1128_v39 = vld [vmem:[%s2212_s7 + $0x58] sm:$0xff] }
 0x201   : > { %v768_v44 = vpop.f32.mrf.mxu0  ;;  %1365 = vmatpush.msra.mxu1 %v1128_v39  ;;  %1141 = vmatpush.msrb.mxu0 %v1128_v39 }
 0x202   : > { %v809_v45 = vpop.f32.mrf.mxu1  ;;  %v873_v47 = vmul.f32 %v1504_v60, %v865_v41  ;;  %v769_v59 = vadd.f32 %v768_v44, %v2009_v14  ;;  %v1127_v44 = vld [vmem:[%s2212_s7 + $0x50] sm:$0xff] }
 0x203   : > { %v810_v51 = vadd.f32 %v809_v45, %v2007_v11  ;;  %1366 = vmatpush.msra.mxu1 %v1127_v44  ;;  %1142 = vmatpush.msrb.mxu0 %v1127_v44 }
 0x204   : > { %957 = vmatmul.f32.gmra.mxu2 %v873_v47  ;;  %998 = vmatmul.f32.gmra.mxu3 %v873_v47 }
 0x205   : > { %v1506_v53 = vpop.eup %1505  ;;  %v843_v57 = vmul.f32 0.5, %v810_v51  ;;  %1039 = vmatmul.f32.gmra.mxu0 %v873_v47 }
 0x206   : > { %v858_v16 = vmul.f32 0.5, %v1506_v53  ;;  %v1508_v0 = vpop.eup %1507 }
 0x207   : > { %1509 = vtanh.f32 %v843_v57  ;;  %v727_v61 = vpop.f32.mrf.mxu3 }
 0x208   : > { %v866_v62 = vadd.f32 0.5, %v858_v16  ;;  %v2031_v63 = vadd.f32 %v727_v61, %v2012_v17  ;;  %1511 = vtanh.f32 %v769_v59  ;;  %v1126_v16 = vld [vmem:[%s2212_s7 + $0x48] sm:$0xff] }
 0x209   : > { %v771_v1 = vpop.f32.mrf.mxu0  ;;  %1367 = vmatpush.msra.mxu1 %v1126_v16  ;;  %1143 = vmatpush.msrb.mxu0 %v1126_v16 }
 0x20a   : > { %v812_v2 = vpop.f32.mrf.mxu1  ;;  %v874_v3 = vmul.f32 %v1508_v0, %v866_v62  ;;  %v772_v7 = vadd.f32 %v771_v1, %v2009_v14  ;;  %v1125_v62 = vld [vmem:[%s2212_s7 + $0x40] sm:$0xff] }
 0x20b   : > { %v813_v4 = vadd.f32 %v812_v2, %v2007_v11  ;;  %1368 = vmatpush.msra.mxu1 %v1125_v62  ;;  %1144 = vmatpush.msrb.mxu0 %v1125_v62 }
 0x20c   : > { %960 = vmatmul.f32.gmra.mxu2 %v874_v3  ;;  %1001 = vmatmul.f32.gmra.mxu3 %v874_v3 }
 0x20d   : > { %v1510_v5 = vpop.eup %1509  ;;  %v844_v6 = vmul.f32 0.5, %v813_v4  ;;  %1042 = vmatmul.f32.gmra.mxu0 %v874_v3  ;;  %v1124_v3 = vld [vmem:[%s2212_s7 + $0x38] sm:$0xff] }
 0x20e   : > { %v859_v29 = vmul.f32 0.5, %v1510_v5  ;;  %v1512_v12 = vpop.eup %1511  ;;  %1369 = vmatpush.msra.mxu1 %v1124_v3  ;;  %v1123_v5 = vld [vmem:[%s2212_s7 + $0x30] sm:$0xff]  ;;  %1145 = vmatpush.msrb.mxu0 %v1124_v3 }
 0x20f   : > { %1513 = vtanh.f32 %v844_v6  ;;  %v730_v8 = vpop.f32.mrf.mxu3 }
 0x210   : > { %v867_v9 = vadd.f32 0.5, %v859_v29  ;;  %v2036_v10 = vadd.f32 %v730_v8, %v2012_v17  ;;  %1515 = vtanh.f32 %v772_v7  ;;  %1370 = vmatpush.msra.mxu1 %v1123_v5  ;;  %1146 = vmatpush.msrb.mxu0 %v1123_v5 }
 0x211   : > { %v774_v13 = vpop.f32.mrf.mxu0 }
 0x212   : > { %v815_v15 = vpop.f32.mrf.mxu1  ;;  %v875_v18 = vmul.f32 %v1512_v12, %v867_v9  ;;  %v775_v25 = vadd.f32 %v774_v13, %v2009_v14  ;;  %v1122_v13 = vld [vmem:[%s2212_s7 + $0x28] sm:$0xff] }
 0x213   : > { %v816_v19 = vadd.f32 %v815_v15, %v2007_v11  ;;  %1371 = vmatpush.msra.mxu1 %v1122_v13  ;;  %1147 = vmatpush.msrb.mxu0 %v1122_v13  ;;  %v1121_v15 = vld [vmem:[%s2212_s7 + $0x20] sm:$0xff] }
 0x214   : > { %963 = vmatmul.f32.gmra.mxu2 %v875_v18  ;;  %1004 = vmatmul.f32.gmra.mxu3 %v875_v18 }
 0x215   : > { %v1514_v20 = vpop.eup %1513  ;;  %v845_v22 = vmul.f32 0.5, %v816_v19  ;;  %1045 = vmatmul.f32.gmra.mxu0 %v875_v18  ;;  %1372 = vmatpush.msra.mxu1 %v1121_v15  ;;  %v1120_v18 = vld [vmem:[%s2212_s7 + $0x18] sm:$0xff]  ;;  %v1119_v19 = vld [vmem:[%s2212_s7 + $0x10] sm:$0xff] }
 0x216   : > { %v860_v24 = vmul.f32 0.5, %v1514_v20  ;;  %v1516_v32 = vpop.eup %1515  ;;  %1148 = vmatpush.msrb.mxu0 %v1121_v15  ;;  %v1118_v20 = vld [vmem:[%s2212_s7 + $0x8] sm:$0xff] }
 0x217   : > { %1517 = vtanh.f32 %v845_v22  ;;  %v733_v26 = vpop.f32.mrf.mxu3  ;;  %1373 = vmatpush.msra.mxu1 %v1120_v18  ;;  %v1117_v22 = vld [vmem:[%s2212_s7] sm:$0xff] }
 0x218   : > { %v868_v28 = vadd.f32 0.5, %v860_v24  ;;  %v2050_v30 = vadd.f32 %v733_v26, %v2012_v17  ;;  %1519 = vtanh.f32 %v775_v25  ;;  %1149 = vmatpush.msrb.mxu0 %v1120_v18  ;;  %v2106_v24 = vperm.slane %v2101_v23, 2 }
 0x219   : > { %v777_v33 = vpop.f32.mrf.mxu0  ;;  %1374 = vmatpush.msra.mxu1 %v1119_v19 }
 0x21a   : > { %v818_v55 = vpop.f32.mrf.mxu1  ;;  %v876_v34 = vmul.f32 %v1516_v32, %v868_v28  ;;  %v778_v41 = vadd.f32 %v777_v33, %v2009_v14  ;;  %1150 = vmatpush.msrb.mxu0 %v1119_v19 }
 0x21b   : > { %v819_v35 = vadd.f32 %v818_v55, %v2007_v11  ;;  %1375 = vmatpush.msra.mxu1 %v1118_v20 }
 0x21c   : > { %966 = vmatmul.f32.gmra.mxu2 %v876_v34  ;;  %1007 = vmatmul.f32.gmra.mxu3 %v876_v34 }
 0x21d   : > { %v1518_v37 = vpop.eup %1517  ;;  %v846_v38 = vmul.f32 0.5, %v819_v35  ;;  %1048 = vmatmul.f32.gmra.mxu0 %v876_v34  ;;  %1376 = vmatpush.msra.mxu1 %v1117_v22 }
 0x21e   : > { %v861_v40 = vmul.f32 0.5, %v1518_v37  ;;  %v1520_v51 = vpop.eup %1519  ;;  %1151 = vmatpush.msrb.mxu0 %v1118_v20 }
 0x21f   : > { %1521 = vtanh.f32 %v846_v38  ;;  %v736_v60 = vpop.f32.mrf.mxu3 }
 0x220   : > { %v869_v45 = vadd.f32 0.5, %v861_v40  ;;  %v2064_v47 = vadd.f32 %v736_v60, %v2012_v17  ;;  %1523 = vtanh.f32 %v778_v41  ;;  %1152 = vmatpush.msrb.mxu0 %v1117_v22 }
 0x221   : > { %v780_v61 = vpop.f32.mrf.mxu0 }
 0x222   : > { %v821_v53 = vpop.f32.mrf.mxu1  ;;  %v877_v57 = vmul.f32 %v1520_v51, %v869_v45 }
 0x223   : > { %v822_v59 = vadd.f32 %v821_v53, %v2007_v11  ;;  %v781_v11 = vadd.f32 %v780_v61, %v2009_v14 }
 0x224   : > { %969 = vmatmul.f32.gmra.mxu2 %v877_v57  ;;  %1010 = vmatmul.f32.gmra.mxu3 %v877_v57 }
 0x225   : > { %v1522_v0 = vpop.eup %1521  ;;  %v847_v1 = vmul.f32 0.5, %v822_v59  ;;  %1051 = vmatmul.f32.gmra.mxu0 %v877_v57 }
 0x226   : > { %v862_v2 = vmul.f32 0.5, %v1522_v0  ;;  %v1524_v6 = vpop.eup %1523 }
 0x227   : > { %1525 = vtanh.f32 %v847_v1  ;;  %v2103_v43 = vpop.f32.mrf.mxu3 }
 0x228   : > { %v870_v4 = vadd.f32 0.5, %v862_v2  ;;  %1527 = vtanh.f32 %v781_v11 }
 0x22a   : > { %v878_v29 = vmul.f32 %v1524_v6, %v870_v4 }
 0x22c   : > { %972 = vmatmul.f32.gmra.mxu2 %v878_v29  ;;  %1013 = vmatmul.f32.gmra.mxu3 %v878_v29 }
 0x22d   : > { %v1526_v7 = vpop.eup %1525  ;;  %1054 = vmatmul.f32.gmra.mxu0 %v878_v29 }
 0x22e   : > { %v863_v8 = vmul.f32 0.5, %v1526_v7  ;;  %v1528_v9 = vpop.eup %1527 }
 0x230   : > { %v871_v14 = vadd.f32 0.5, %v863_v8 }
 0x232   : > { %v879_v12 = vmul.f32 %v1528_v9, %v871_v14 }
 0x234   : > { %975 = vmatmul.f32.gmra.mxu2 %v879_v12  ;;  %1016 = vmatmul.f32.gmra.mxu3 %v879_v12 }
 0x235   : > { %1057 = vmatmul.f32.gmra.mxu0 %v879_v12 }
 0x27a   : > { %v1037_v25 = vpop.f32.mrf.mxu0 }
 0x27b   : > { %v1038_v26 = vadd.f32 %v1037_v25, %v2106_v24 }
 0x27d   : > { %v1077_v28 = vmul.f32 0.5, %v1038_v26 }
 0x27f   : > { %1529 = vtanh.f32 %v1077_v28  ;;  %v996_v32 = vpop.f32.mrf.mxu3 }
 0x280   : > { %v997_v33 = vadd.f32 %v996_v32, %v2110_v27 }
 0x282   : > { %1531 = vtanh.f32 %v997_v33  ;;  %v1040_v55 = vpop.f32.mrf.mxu0 }
 0x283   : > { %v1041_v34 = vadd.f32 %v1040_v55, %v2106_v24 }
 0x285   : > { %v1530_v35 = vpop.eup %1529  ;;  %v1078_v36 = vmul.f32 0.5, %v1041_v34 }
 0x286   : > { %v1093_v37 = vmul.f32 0.5, %v1530_v35 }
 0x287   : > { %1533 = vtanh.f32 %v1078_v36  ;;  %v999_v38 = vpop.f32.mrf.mxu3 }
 0x288   : > { %v1532_v39 = vpop.eup %1531  ;;  %v1101_v40 = vadd.f32 0.5, %v1093_v37  ;;  %v1000_v41 = vadd.f32 %v999_v38, %v2110_v27 }
 0x28a   : > { %1535 = vtanh.f32 %v1000_v41  ;;  %v1043_v60 = vpop.f32.mrf.mxu0  ;;  %v1109_v44 = vmul.f32 %v1532_v39, %v1101_v40 }
 0x28b   : > { %v1044_v45 = vadd.f32 %v1043_v60, %v2106_v24 }
 0x28c   : > { %1153 = vmatmul.f32.vlgmr.msrb.gmra.mxu0 %v1109_v44 }
 0x28d   : > { %v1534_v51 = vpop.eup %1533  ;;  %v1079_v53 = vmul.f32 0.5, %v1044_v45 }
 0x28e   : > { %v1094_v57 = vmul.f32 0.5, %v1534_v51 }
 0x28f   : > { %1537 = vtanh.f32 %v1079_v53  ;;  %v1002_v16 = vpop.f32.mrf.mxu3 }
 0x290   : > { %v1536_v59 = vpop.eup %1535  ;;  %v1102_v61 = vadd.f32 0.5, %v1094_v57  ;;  %v1003_v62 = vadd.f32 %v1002_v16, %v2110_v27 }
 0x292   : > { %1539 = vtanh.f32 %v1003_v62  ;;  %v1046_v0 = vpop.f32.mrf.mxu0  ;;  %v1110_v1 = vmul.f32 %v1536_v59, %v1102_v61 }
 0x293   : > { %v1047_v2 = vadd.f32 %v1046_v0, %v2106_v24 }
 0x294   : > { %1156 = vmatmul.f32.vlgmr.msra.gmra.mxu1 %v1110_v1 }
 0x295   : > { %v1538_v3 = vpop.eup %1537  ;;  %v1080_v11 = vmul.f32 0.5, %v1047_v2 }
 0x296   : > { %v1095_v4 = vmul.f32 0.5, %v1538_v3 }
 0x297   : > { %1541 = vtanh.f32 %v1080_v11  ;;  %v1005_v5 = vpop.f32.mrf.mxu3 }
 0x298   : > { %v1540_v6 = vpop.eup %1539  ;;  %v1006_v29 = vadd.f32 %v1005_v5, %v2110_v27  ;;  %v1103_v7 = vadd.f32 0.5, %v1095_v4 }
 0x29a   : > { %1543 = vtanh.f32 %v1006_v29  ;;  %v1049_v8 = vpop.f32.mrf.mxu0  ;;  %v1111_v14 = vmul.f32 %v1540_v6, %v1103_v7 }
 0x29b   : > { %v1050_v9 = vadd.f32 %v1049_v8, %v2106_v24 }
 0x29c   : > { %1159 = vmatmul.f32.gmra.mxu1 %v1111_v14  ;;  %v955_v14 = vpop.f32.mrf.mxu2 }
 0x29d   : > { %v1542_v12 = vpop.eup %1541  ;;  %v1081_v13 = vmul.f32 0.5, %v1050_v9 }
 0x29e   : > { %v1096_v15 = vmul.f32 0.5, %v1542_v12  ;;  %v932_v12 = vperm.slane %v2101_v23, 0  ;;  %v825_v23 = vadd.f32 %v2021_v31, %v1946_v48  ;;  %v827_v48 = vadd.f32 %v2031_v63, %v1958_v56 }
 0x29f   : > { %1545 = vtanh.f32 %v1081_v13  ;;  %v1008_v18 = vpop.f32.mrf.mxu3  ;;  %v829_v56 = vadd.f32 %v2050_v30, %v1949_v50  ;;  %v740_v30 = vadd.f32 %v2103_v43, %v2012_v17 }
 0x2a0   : > { %v1544_v19 = vpop.eup %1543  ;;  %v1009_v20 = vadd.f32 %v1008_v18, %v2110_v27  ;;  %v1104_v22 = vadd.f32 0.5, %v1096_v15  ;;  %v956_v13 = vadd.f32 %v955_v14, %v932_v12  ;;  %v824_v15 = vadd.f32 %v2016_v21, %v1940_v42 }
 0x2a2   : > { %1547 = vtanh.f32 %v1009_v20  ;;  %v1052_v25 = vpop.f32.mrf.mxu0  ;;  %v1112_v26 = vmul.f32 %v1544_v19, %v1104_v22  ;;  %v1061_v20 = vadd.f32 %v956_v13, %v824_v15 }
 0x2a3   : > { %v1053_v28 = vadd.f32 %v1052_v25, %v2106_v24 }
 0x2a4   : > { %1162 = vmatmul.f32.gmra.mxu1 %v1112_v26  ;;  %v958_v9 = vpop.f32.mrf.mxu2 }
 0x2a5   : > { %v1546_v32 = vpop.eup %1545  ;;  %v1082_v33 = vmul.f32 0.5, %v1053_v28  ;;  %v959_v26 = vadd.f32 %v958_v9, %v932_v12 }
 0x2a6   : > { %v1097_v55 = vmul.f32 0.5, %v1546_v32 }
 0x2a7   : > { %1549 = vtanh.f32 %v1082_v33  ;;  %v1011_v34 = vpop.f32.mrf.mxu3  ;;  %v1062_v42 = vadd.f32 %v959_v26, %v825_v23 }
 0x2a8   : > { %v1548_v35 = vpop.eup %1547  ;;  %v1012_v36 = vadd.f32 %v1011_v34, %v2110_v27  ;;  %v1105_v37 = vadd.f32 0.5, %v1097_v55  ;;  %v826_v34 = vadd.f32 %v2026_v49, %v1952_v52  ;;  %v828_v49 = vadd.f32 %v2036_v10, %v1943_v46 }
 0x2a9   : > { %v830_v10 = vadd.f32 %v2064_v47, %v1955_v54  ;;  %v831_v54 = vadd.f32 %v740_v30, %v1961_v58 }
 0x2aa   : > { %1551 = vtanh.f32 %v1012_v36  ;;  %v1055_v38 = vpop.f32.mrf.mxu0  ;;  %v1113_v39 = vmul.f32 %v1548_v35, %v1105_v37 }
 0x2ab   : > { %v1056_v40 = vadd.f32 %v1055_v38, %v2106_v24 }
 0x2ac   : > { %1165 = vmatmul.f32.gmra.mxu1 %v1113_v39  ;;  %v961_v18 = vpop.f32.mrf.mxu2 }
 0x2ad   : > { %v1550_v41 = vpop.eup %1549  ;;  %v1083_v60 = vmul.f32 0.5, %v1056_v40  ;;  %v962_v55 = vadd.f32 %v961_v18, %v932_v12 }
 0x2ae   : > { %v1098_v44 = vmul.f32 0.5, %v1550_v41 }
 0x2af   : > { %1553 = vtanh.f32 %v1083_v60  ;;  %v1014_v45 = vpop.f32.mrf.mxu3  ;;  %v1063_v36 = vadd.f32 %v962_v55, %v826_v34 }
 0x2b0   : > { %v1552_v51 = vpop.eup %1551  ;;  %v1015_v53 = vadd.f32 %v1014_v45, %v2110_v27  ;;  %v1106_v57 = vadd.f32 0.5, %v1098_v44 }
 0x2b2   : > { %1555 = vtanh.f32 %v1015_v53  ;;  %v1058_v16 = vpop.f32.mrf.mxu0  ;;  %v1114_v59 = vmul.f32 %v1552_v51, %v1106_v57 }
 0x2b3   : > { %v1059_v61 = vadd.f32 %v1058_v16, %v2106_v24 }
 0x2b4   : > { %1168 = vmatmul.f32.gmra.mxu1 %v1114_v59  ;;  %v964_v32 = vpop.f32.mrf.mxu2 }
 0x2b5   : > { %v1554_v62 = vpop.eup %1553  ;;  %v1084_v0 = vmul.f32 0.5, %v1059_v61  ;;  %v965_v40 = vadd.f32 %v964_v32, %v932_v12 }
 0x2b6   : > { %v1099_v1 = vmul.f32 0.5, %v1554_v62 }
 0x2b7   : > { %1557 = vtanh.f32 %v1084_v0  ;;  %v1017_v2 = vpop.f32.mrf.mxu3  ;;  %v1064_v41 = vadd.f32 %v965_v40, %v827_v48 }
 0x2b8   : > { %v1556_v3 = vpop.eup %1555  ;;  %v1018_v11 = vadd.f32 %v1017_v2, %v2110_v27  ;;  %v1107_v4 = vadd.f32 0.5, %v1099_v1  ;;  %v2132_v27 = vld [vmem:[%s2213_s8] ss:$0 sm:$0xff] }
 0x2ba   : > { %1559 = vtanh.f32 %v1018_v11  ;;  %v1115_v5 = vmul.f32 %v1556_v3, %v1107_v4 }
 0x2bc   : > { %1171 = vmatmul.f32.gmra.mxu1 %v1115_v5  ;;  %v967_v39 = vpop.f32.mrf.mxu2 }
 0x2bd   : > { %v1558_v6 = vpop.eup %1557  ;;  %v968_v45 = vadd.f32 %v967_v39, %v932_v12 }
 0x2be   : > { %v1100_v29 = vmul.f32 0.5, %v1558_v6 }
 0x2bf   : > { %v1065_v53 = vadd.f32 %v968_v45, %v828_v49 }
 0x2c0   : > { %v1560_v7 = vpop.eup %1559  ;;  %v1108_v8 = vadd.f32 0.5, %v1100_v29 }
 0x2c2   : > { %v1116_v24 = vmul.f32 %v1560_v7, %v1108_v8 }
 0x2c4   : > { %1174 = vmatmul.f32.gmra.mxu1 %v1116_v24  ;;  %v970_v52 = vpop.f32.mrf.mxu2 }
 0x2c5   : > { %v971_v59 = vadd.f32 %v970_v52, %v932_v12 }
 0x2c7   : > { %v1066_v62 = vadd.f32 %v971_v59, %v829_v56 }
 0x2cc   : > { %v973_v63 = vpop.f32.mrf.mxu2 }
 0x2cd   : > { %v974_v46 = vadd.f32 %v973_v63, %v932_v12 }
 0x2cf   : > { %v1067_v3 = vadd.f32 %v974_v46, %v830_v10 }
 0x2d4   : > { %v976_v50 = vpop.f32.mrf.mxu2 }
 0x2d5   : > { %v977_v5 = vadd.f32 %v976_v50, %v932_v12 }
 0x2d7   : > { %v1068_v6 = vadd.f32 %v977_v5, %v831_v54 }
 0x309   : > { %v1154_v19 = vpop.f32.mrf.mxu0 }
 0x30a   : > { %v1155_v22 = vadd.f32 %v2132_v27, %v1154_v19 }
 0x30c   : > { %v1178_v25 = vadd.f32 %v1155_v22, %v1061_v20 }
 0x30e   : > { %1186 = vst [vmem:[%s2139_s3] sm:$0xff] %v1178_v25 }
 0x311   : > { %v1157_v28 = vpop.f32.mrf.mxu1 }
 0x312   : > { %v1158_v21 = vadd.f32 %v2132_v27, %v1157_v28 }
 0x314   : > { %v1179_v33 = vadd.f32 %v1158_v21, %v1062_v42 }
 0x316   : > { %1187 = vst [vmem:[%s2139_s3 + $0x8] sm:$0xff] %v1179_v33 }
 0x319   : > { %v1160_v35 = vpop.f32.mrf.mxu1 }
 0x31a   : > { %v1161_v37 = vadd.f32 %v2132_v27, %v1160_v35 }
 0x31c   : > { %v1180_v38 = vadd.f32 %v1161_v37, %v1063_v36 }
 0x31e   : > { %1188 = vst [vmem:[%s2139_s3 + $0x10] sm:$0xff] %v1180_v38 }
 0x321   : > { %v1163_v31 = vpop.f32.mrf.mxu1 }
 0x322   : > { %v1164_v60 = vadd.f32 %v2132_v27, %v1163_v31 }
 0x324   : > { %v1181_v44 = vadd.f32 %v1164_v60, %v1064_v41 }
 0x326   : > { %1189 = vst [vmem:[%s2139_s3 + $0x18] sm:$0xff] %v1181_v44 }
 0x329   : > { %v1166_v51 = vpop.f32.mrf.mxu1 }
 0x32a   : > { %v1167_v57 = vadd.f32 %v2132_v27, %v1166_v51 }
 0x32c   : > { %v1182_v16 = vadd.f32 %v1167_v57, %v1065_v53 }
 0x32e   : > { %1190 = vst [vmem:[%s2139_s3 + $0x20] sm:$0xff] %v1182_v16 }
 0x331   : > { %v1169_v61 = vpop.f32.mrf.mxu1 }
 0x332   : > { %v1170_v0 = vadd.f32 %v2132_v27, %v1169_v61 }
 0x334   : > { %v1183_v1 = vadd.f32 %v1170_v0, %v1066_v62 }
 0x336   : > { %1191 = vst [vmem:[%s2139_s3 + $0x28] sm:$0xff] %v1183_v1 }
 0x339   : > { %v1172_v2 = vpop.f32.mrf.mxu1 }
 0x33a   : > { %v1173_v11 = vadd.f32 %v2132_v27, %v1172_v2 }
 0x33c   : > { %v1184_v4 = vadd.f32 %v1173_v11, %v1067_v3 }
 0x33e   : > { %1192 = vst [vmem:[%s2139_s3 + $0x30] sm:$0xff] %v1184_v4 }
 0x341   : > { %v1175_v47 = vpop.f32.mrf.mxu1 }
 0x342   : > { %v1176_v29 = vadd.f32 %v2132_v27, %v1175_v47 }
 0x344   : > { %v1185_v7 = vadd.f32 %v1176_v29, %v1068_v6 }
 0x346   : > { %1193 = vst [vmem:[%s2139_s3 + $0x38] sm:$0xff] %v1185_v7 }
 0x347   : > { %1708 = shalt.err (!%p1705_p8)
}
 0x348   : > { %s1765_s28 = smov 128   ;;  %s1766_s24 = smov 8  }
 0x349   : > { %1393 = dma.vmem_to_hbm [thread:$0]  (%p1855_p5), %s1208_s18, 1024, %s1210_s21, %s1195_s13, %s1765_s28, %s1765_s28, %s1766_s24  }
 0x34a PF: > { %p1420_p9 = scmp.ge.s32.totalorder %s1755_s12, 2  ;;  %s1224_s26 = sand.u32 1, %s1743_s30  }
 0x34b   : > { %s1225_s3 = scalar_lea.sflag [#allocation4], %s1224_s26 }
 0x34c   : > { %p1409_p10 = pnand %p1420_p9, %p1859_p6 }
 0x34e   : > { %p1410_p11 = pneg %p1409_p10 }
 0x350   : > { %1738 = dma.done.wait (%p1410_p11), %s1225_s3, 1024  }
 0x351   : > { %1740 = vsyncadd (%p1410_p11), %s1225_s3, 4294966272  ;;  %s2229_s12 = sld [smem:[#allocation16_spill]]  ;;  %s2232_s30 = smov %s1747_s10 }
 0x352   : > { %s2230_s16 = sld [smem:[#allocation15_spill]] }
 0x353   : > { %s2231_s11 = sld [smem:[#allocation17_spill]] }
 0x357   : > { %p22_p12 = scmp.ge.s32.totalorder %s2229_s12, 4  }
 0x358   : > { %s2233_s10 = smov %s2230_s16 }
 0x359   :  { %24 = sbr.rel (!%p22_p12) target bundleno = 9 (0x9), region = 110 }
 0x35e   :  { %1231 = vsyncpa [#allocation3], 1 }
 0x35f   :  { %1233 = vsyncpa [#allocation3 + $0x1], 1 }
 0x360   :  { %1234 = vsyncpa [#allocation6], 1 }
 0x361   :  { %1235 = vsyncpa [#allocation9], 1 }
 0x362   :  { %1236 = vsyncpa [#allocation4], 1 }
 0x363   :  { %1238 = vsyncpa [#allocation4 + $0x1], 1 }

</bundles_post_ra>
